<compile_context>
chip_gen: v5e
topology: v5e:2x2
jax: 0.10.0
libtpu: 0.0.40
codegen_flags: <defaults>
</compile_context>

<pallas_src>
import math

import jax
import jax.numpy as jnp
from jax.experimental import pallas as pl
from jax.experimental.pallas import tpu as pltpu

# --------------------------- small synthetic config -------------------------
VOCAB_SIZE = 100
MAX_POS = 64
HIDDEN = 32
NUM_HEADS = 4
HEAD_DIM = HIDDEN // NUM_HEADS
NUM_LAYERS = 2
BATCH = 2
SEQ = 8
ROWS = BATCH * SEQ                      # batch folded into sublane rows

# packed weight-matrix slots: w_stack is (L, 6, H, H)
W_Q, W_K, W_V, W_O, W_FF1, W_FF2 = range(6)
# packed vector slots: v_stack is (L, 10, H)
V_BQ, V_BK, V_BV, V_BO, V_LN1G, V_LN1B, V_LN2G, V_LN2B, V_B1, V_B2 = range(10)


def _layernorm(x, gamma, beta, eps):
    mean = jnp.mean(x, axis=-1, keepdims=True)
    var = jnp.mean((x - mean) ** 2, axis=-1, keepdims=True)
    return (x - mean) * jax.lax.rsqrt(var + eps) * gamma + beta


# ------------------------------ fused kernel --------------------------------
def fused_encoder_kernel(x_ref, embln_ref, w_ref, v_ref, o_ref):
    layer = pl.program_id(0)

    # ---- step 0: embeddings LayerNorm (eps=1e-12); result becomes the
    #      VMEM-resident activation for the whole layer stack ----
    @pl.when(layer == 0)
    def _init():
        xe = x_ref[...]                                     # (ROWS, H)
        g = embln_ref[0:1, :]
        b = embln_ref[1:2, :]
        o_ref[...] = _layernorm(xe, g, b, 1e-12)
        # TODO(synk): nn.Dropout() on embeddings is identity in eval mode.

    x = o_ref[...]                                          # (ROWS, H), resident
    vecs = v_ref[0]                                         # (10, H)

    # ---------------- pre-LN #1 + multi-head self-attention -----------------
    h1 = _layernorm(x, vecs[V_LN1G:V_LN1G + 1, :],
                    vecs[V_LN1B:V_LN1B + 1, :], 1e-5)

    q = jnp.dot(h1, w_ref[0, W_Q],
                preferred_element_type=jnp.float32) + vecs[V_BQ:V_BQ + 1, :]
    k = jnp.dot(h1, w_ref[0, W_K],
                preferred_element_type=jnp.float32) + vecs[V_BK:V_BK + 1, :]
    v = jnp.dot(h1, w_ref[0, W_V],
                preferred_element_type=jnp.float32) + vecs[V_BV:V_BV + 1, :]
    wo = w_ref[0, W_O]                                      # (H, H)

    scale = 1.0 / math.sqrt(HEAD_DIM)
    attn = jnp.zeros((ROWS, HIDDEN), jnp.float32)
    for h in range(NUM_HEADS):                              # static unrolled (4)
        c0 = h * HEAD_DIM
        qh = q[:, c0:c0 + HEAD_DIM].reshape(BATCH, SEQ, HEAD_DIM)
        kh = k[:, c0:c0 + HEAD_DIM].reshape(BATCH, SEQ, HEAD_DIM)
        vh = v[:, c0:c0 + HEAD_DIM].reshape(BATCH, SEQ, HEAD_DIM)
        s = jnp.einsum('bqd,bkd->bqk', qh, kh,
                       preferred_element_type=jnp.float32) * scale
        s = s - jnp.max(s, axis=-1, keepdims=True)          # stable softmax
        e = jnp.exp(s)
        p = e / jnp.sum(e, axis=-1, keepdims=True)
        ctx = jnp.einsum('bqk,bkd->bqd', p, vh,
                         preferred_element_type=jnp.float32)
        ctx2d = ctx.reshape(ROWS, HEAD_DIM)
        # head-concat + output projection fused as an accumulation (no concat)
        attn = attn + jnp.dot(ctx2d, wo[c0:c0 + HEAD_DIM, :],
                              preferred_element_type=jnp.float32)
    x = x + attn + vecs[V_BO:V_BO + 1, :]                   # residual 1

    # ------------- pre-LN #2 + feed-forward (Linear -> GELU -> Linear) ------
    h2 = _layernorm(x, vecs[V_LN2G:V_LN2G + 1, :],
                    vecs[V_LN2B:V_LN2B + 1, :], 1e-5)
    f = jnp.dot(h2, w_ref[0, W_FF1],
                preferred_element_type=jnp.float32) + vecs[V_B1:V_B1 + 1, :]
    f = 0.5 * f * (1.0 + jax.lax.erf(f / math.sqrt(2.0)))   # exact GELU
    f = jnp.dot(f, w_ref[0, W_FF2],
                preferred_element_type=jnp.float32) + vecs[V_B2:V_B2 + 1, :]
    # TODO(synk): FeedForward dropout is identity in eval mode.
    x = x + f                                               # residual 2

    o_ref[...] = x      # stays resident across layers; single HBM writeback


# -------------------------------- wrapper ------------------------------------
def transformer_encoder(input_ids, params):
    B, S = input_ids.shape
    # Embedding gathers stay in plain JAX glue (data-dependent lookup).
    tok = params["token_emb"][input_ids]                    # (B, S, H)
    pos = params["pos_emb"][:S]                             # (S, H)
    x_in = (tok + pos[None, :, :]).reshape(B * S, HIDDEN).astype(jnp.float32)

    out2d = pl.pallas_call(
        fused_encoder_kernel,
        out_shape=jax.ShapeDtypeStruct((B * S, HIDDEN), jnp.float32),
        grid=(NUM_LAYERS,),
        in_specs=[
            pl.BlockSpec((B * S, HIDDEN), lambda l: (0, 0)),          # x_in
            pl.BlockSpec((2, HIDDEN), lambda l: (0, 0)),              # emb LN
            pl.BlockSpec((1, 6, HIDDEN, HIDDEN), lambda l: (l, 0, 0, 0)),
            pl.BlockSpec((1, 10, HIDDEN), lambda l: (l, 0, 0)),
        ],
        out_specs=pl.BlockSpec((B * S, HIDDEN), lambda l: (0, 0)),
        compiler_params=pltpu.CompilerParams(
            dimension_semantics=("arbitrary",)),    # layers are sequential
    )(x_in, params["emb_ln"], params["w_stack"], params["v_stack"])
    return out2d.reshape(B, S, HIDDEN)


# ----------------------- deterministic parameter init -----------------------
def init_params(key):
    def nrm(k, shape, scale=0.02):
        return (scale * jax.random.normal(k, shape)).astype(jnp.float32)

    keys = jax.random.split(key, 2 + NUM_LAYERS)
    token_emb = nrm(keys[0], (VOCAB_SIZE, HIDDEN))
    pos_emb = nrm(keys[1], (MAX_POS, HIDDEN))
    emb_ln = jnp.stack([jnp.ones((HIDDEN,), jnp.float32),    # gamma
                        jnp.zeros((HIDDEN,), jnp.float32)])  # beta

    zeros = jnp.zeros((HIDDEN,), jnp.float32)
    ones = jnp.ones((HIDDEN,), jnp.float32)
    w_layers, v_layers = [], []
    for li in range(NUM_LAYERS):
        lk = jax.random.split(keys[2 + li], 6)
        # order: wq, wk, wv, wo, w_ff1, w_ff2
        w_layers.append(jnp.stack([nrm(lk[i], (HIDDEN, HIDDEN)) for i in range(6)]))
        # order: bq, bk, bv, bo, ln1_g, ln1_b, ln2_g, ln2_b, b1, b2
        v_layers.append(jnp.stack([zeros, zeros, zeros, zeros,
                                   ones, zeros, ones, zeros,
                                   zeros, zeros]))
    return {
        "token_emb": token_emb,
        "pos_emb": pos_emb,
        "emb_ln": emb_ln,                       # (2, H)
        "w_stack": jnp.stack(w_layers),         # (L, 6, H, H)
        "v_stack": jnp.stack(v_layers),         # (L, 10, H)
    }


if __name__ == "__main__":
    key = jax.random.PRNGKey(0)
    pkey, dkey = jax.random.split(key)
    params = init_params(pkey)
    input_ids = jax.random.randint(dkey, (BATCH, SEQ), 0, VOCAB_SIZE, dtype=jnp.int32)

    out = transformer_encoder(input_ids, params)
    jax.block_until_ready(out)
    assert out.shape == (BATCH, SEQ, HIDDEN), out.shape
    assert bool(jnp.all(jnp.isfinite(out))), "non-finite values in output"
    print("KERNEL_OK")
</pallas_src>

<mosaic_0001>
module attributes {stable_mosaic.version = 11 : i64} {
  func.func @fused_encoder_kernel(%arg0: i32, %arg1: memref<16x32xf32, #tpu.memory_space<vmem>>, %arg2: memref<2x32xf32, #tpu.memory_space<vmem>>, %arg3: memref<1x6x32x32xf32, #tpu.memory_space<vmem>>, %arg4: memref<1x10x32xf32, #tpu.memory_space<vmem>>, %arg5: memref<16x32xf32, #tpu.memory_space<vmem>>) attributes {dimension_semantics = [#tpu.dimension_semantics<arbitrary>], iteration_bounds = array<i64: 2>, scalar_prefetch = 0 : i64, scratch_operands = 0 : i64, tpu.core_type = #tpu.core_type<tc>, window_params = [{pipeline_mode = #tpu.pipeline_mode<synchronous>, transform_indices = @transform_0, window_bounds = array<i64: 16, 32>}, {pipeline_mode = #tpu.pipeline_mode<synchronous>, transform_indices = @transform_1, window_bounds = array<i64: 2, 32>}, {transform_indices = @transform_2, window_bounds = array<i64: 1, 6, 32, 32>}, {transform_indices = @transform_3, window_bounds = array<i64: 1, 10, 32>}, {pipeline_mode = #tpu.pipeline_mode<synchronous>, transform_indices = @transform_4, window_bounds = array<i64: 16, 32>}]} {
    %c0_i32 = arith.constant 0 : i32
    %0 = arith.cmpi eq, %arg0, %c0_i32 : i32
    %1 = arith.extui %0 : i1 to i32
    %c0_i32_0 = arith.constant 0 : i32
    %2 = arith.cmpi ne, %1, %c0_i32_0 : i32
    scf.if %2 {
      %c0_68 = arith.constant 0 : index
      %c0_69 = arith.constant 0 : index
      %193 = vector.load %arg1[%c0_68, %c0_69] : memref<16x32xf32, #tpu.memory_space<vmem>>, vector<16x32xf32>
      %c0_70 = arith.constant 0 : index
      %c0_71 = arith.constant 0 : index
      %194 = vector.load %arg2[%c0_70, %c0_71] : memref<2x32xf32, #tpu.memory_space<vmem>>, vector<1x32xf32>
      %c1_72 = arith.constant 1 : index
      %c0_73 = arith.constant 0 : index
      %195 = vector.load %arg2[%c1_72, %c0_73] : memref<2x32xf32, #tpu.memory_space<vmem>>, vector<1x32xf32>
      %cst_74 = arith.constant dense<0.000000e+00> : vector<16xf32>
      %196 = vector.multi_reduction <add>, %193, %cst_74 [1] : vector<16x32xf32> to vector<16xf32>
      %197 = vector.shape_cast %196 : vector<16xf32> to vector<16x1xf32>
      %cst_75 = arith.constant 3.200000e+01 : f32
      %198 = vector.broadcast %cst_75 : f32 to vector<16x1xf32>
      %199 = arith.divf %197, %198 : vector<16x1xf32>
      %200 = vector.broadcast %199 : vector<16x1xf32> to vector<16x32xf32>
      %201 = arith.subf %193, %200 : vector<16x32xf32>
      %202 = arith.mulf %201, %201 : vector<16x32xf32>
      %cst_76 = arith.constant dense<0.000000e+00> : vector<16xf32>
      %203 = vector.multi_reduction <add>, %202, %cst_76 [1] : vector<16x32xf32> to vector<16xf32>
      %204 = vector.shape_cast %203 : vector<16xf32> to vector<16x1xf32>
      %cst_77 = arith.constant 3.200000e+01 : f32
      %205 = vector.broadcast %cst_77 : f32 to vector<16x1xf32>
      %206 = arith.divf %204, %205 : vector<16x1xf32>
      %207 = vector.broadcast %199 : vector<16x1xf32> to vector<16x32xf32>
      %208 = arith.subf %193, %207 : vector<16x32xf32>
      %cst_78 = arith.constant 9.99999996E-13 : f32
      %209 = vector.broadcast %cst_78 : f32 to vector<16x1xf32>
      %210 = arith.addf %206, %209 : vector<16x1xf32>
      %211 = math.rsqrt %210 : vector<16x1xf32>
      %212 = vector.broadcast %211 : vector<16x1xf32> to vector<16x32xf32>
      %213 = arith.mulf %208, %212 : vector<16x32xf32>
      %214 = vector.broadcast %194 : vector<1x32xf32> to vector<16x32xf32>
      %215 = arith.mulf %213, %214 : vector<16x32xf32>
      %216 = vector.broadcast %195 : vector<1x32xf32> to vector<16x32xf32>
      %217 = arith.addf %215, %216 : vector<16x32xf32>
      %c0_79 = arith.constant 0 : index
      %c0_80 = arith.constant 0 : index
      %218 = vector.load %arg5[%c0_79, %c0_80] : memref<16x32xf32, #tpu.memory_space<vmem>>, vector<16x32xf32>
      tpu.vector_store %arg5[%c0_79, %c0_80], %217 {strides = array<i32>} : memref<16x32xf32, #tpu.memory_space<vmem>>, vector<16x32xf32>,
    } else {
    }
    %c0 = arith.constant 0 : index
    %c0_1 = arith.constant 0 : index
    %3 = vector.load %arg5[%c0, %c0_1] : memref<16x32xf32, #tpu.memory_space<vmem>>, vector<16x32xf32>
    %c0_2 = arith.constant 0 : index
    %c0_3 = arith.constant 0 : index
    %c0_4 = arith.constant 0 : index
    %4 = vector.load %arg4[%c0_2, %c0_3, %c0_4] : memref<1x10x32xf32, #tpu.memory_space<vmem>>, vector<1x10x32xf32>
    %5 = vector.shape_cast %4 : vector<1x10x32xf32> to vector<10x32xf32>
    %6 = vector.extract_strided_slice %5 {offsets = [4, 0], sizes = [1, 32], strides = [1, 1]} : vector<10x32xf32> to vector<1x32xf32>
    %7 = vector.extract_strided_slice %5 {offsets = [5, 0], sizes = [1, 32], strides = [1, 1]} : vector<10x32xf32> to vector<1x32xf32>
    %cst = arith.constant dense<0.000000e+00> : vector<16xf32>
    %8 = vector.multi_reduction <add>, %3, %cst [1] : vector<16x32xf32> to vector<16xf32>
    %9 = vector.shape_cast %8 : vector<16xf32> to vector<16x1xf32>
    %cst_5 = arith.constant 3.200000e+01 : f32
    %10 = vector.broadcast %cst_5 : f32 to vector<16x1xf32>
    %11 = arith.divf %9, %10 : vector<16x1xf32>
    %12 = vector.broadcast %11 : vector<16x1xf32> to vector<16x32xf32>
    %13 = arith.subf %3, %12 : vector<16x32xf32>
    %14 = arith.mulf %13, %13 : vector<16x32xf32>
    %cst_6 = arith.constant dense<0.000000e+00> : vector<16xf32>
    %15 = vector.multi_reduction <add>, %14, %cst_6 [1] : vector<16x32xf32> to vector<16xf32>
    %16 = vector.shape_cast %15 : vector<16xf32> to vector<16x1xf32>
    %cst_7 = arith.constant 3.200000e+01 : f32
    %17 = vector.broadcast %cst_7 : f32 to vector<16x1xf32>
    %18 = arith.divf %16, %17 : vector<16x1xf32>
    %19 = vector.broadcast %11 : vector<16x1xf32> to vector<16x32xf32>
    %20 = arith.subf %3, %19 : vector<16x32xf32>
    %cst_8 = arith.constant 9.99999974E-6 : f32
    %21 = vector.broadcast %cst_8 : f32 to vector<16x1xf32>
    %22 = arith.addf %18, %21 : vector<16x1xf32>
    %23 = math.rsqrt %22 : vector<16x1xf32>
    %24 = vector.broadcast %23 : vector<16x1xf32> to vector<16x32xf32>
    %25 = arith.mulf %20, %24 : vector<16x32xf32>
    %26 = vector.broadcast %6 : vector<1x32xf32> to vector<16x32xf32>
    %27 = arith.mulf %25, %26 : vector<16x32xf32>
    %28 = vector.broadcast %7 : vector<1x32xf32> to vector<16x32xf32>
    %29 = arith.addf %27, %28 : vector<16x32xf32>
    %c0_9 = arith.constant 0 : index
    %c0_10 = arith.constant 0 : index
    %c0_11 = arith.constant 0 : index
    %c0_12 = arith.constant 0 : index
    %30 = vector.load %arg3[%c0_9, %c0_10, %c0_11, %c0_12] : memref<1x6x32x32xf32, #tpu.memory_space<vmem>>, vector<1x1x32x32xf32>
    %31 = vector.shape_cast %30 : vector<1x1x32x32xf32> to vector<32x32xf32>
    %cst_13 = arith.constant dense<0.000000e+00> : vector<16x32xf32>
    %32 = tpu.matmul %29, %31, %cst_13 {dimension_numbers = #tpu.dot_dimension_numbers<[1], [0], [0], [1], [0, 0, 1, 1], [], []>} : vector<16x32xf32>, vector<32x32xf32>, vector<16x32xf32> -> vector<16x32xf32>
    %33 = vector.extract_strided_slice %5 {offsets = [0, 0], sizes = [1, 32], strides = [1, 1]} : vector<10x32xf32> to vector<1x32xf32>
    %34 = vector.broadcast %33 : vector<1x32xf32> to vector<16x32xf32>
    %35 = arith.addf %32, %34 : vector<16x32xf32>
    %c0_14 = arith.constant 0 : index
    %c1 = arith.constant 1 : index
    %c0_15 = arith.constant 0 : index
    %c0_16 = arith.constant 0 : index
    %36 = vector.load %arg3[%c0_14, %c1, %c0_15, %c0_16] : memref<1x6x32x32xf32, #tpu.memory_space<vmem>>, vector<1x1x32x32xf32>
    %37 = vector.shape_cast %36 : vector<1x1x32x32xf32> to vector<32x32xf32>
    %cst_17 = arith.constant dense<0.000000e+00> : vector<16x32xf32>
    %38 = tpu.matmul %29, %37, %cst_17 {dimension_numbers = #tpu.dot_dimension_numbers<[1], [0], [0], [1], [0, 0, 1, 1], [], []>} : vector<16x32xf32>, vector<32x32xf32>, vector<16x32xf32> -> vector<16x32xf32>
    %39 = vector.extract_strided_slice %5 {offsets = [1, 0], sizes = [1, 32], strides = [1, 1]} : vector<10x32xf32> to vector<1x32xf32>
    %40 = vector.broadcast %39 : vector<1x32xf32> to vector<16x32xf32>
    %41 = arith.addf %38, %40 : vector<16x32xf32>
    %c0_18 = arith.constant 0 : index
    %c2 = arith.constant 2 : index
    %c0_19 = arith.constant 0 : index
    %c0_20 = arith.constant 0 : index
    %42 = vector.load %arg3[%c0_18, %c2, %c0_19, %c0_20] : memref<1x6x32x32xf32, #tpu.memory_space<vmem>>, vector<1x1x32x32xf32>
    %43 = vector.shape_cast %42 : vector<1x1x32x32xf32> to vector<32x32xf32>
    %cst_21 = arith.constant dense<0.000000e+00> : vector<16x32xf32>
    %44 = tpu.matmul %29, %43, %cst_21 {dimension_numbers = #tpu.dot_dimension_numbers<[1], [0], [0], [1], [0, 0, 1, 1], [], []>} : vector<16x32xf32>, vector<32x32xf32>, vector<16x32xf32> -> vector<16x32xf32>
    %45 = vector.extract_strided_slice %5 {offsets = [2, 0], sizes = [1, 32], strides = [1, 1]} : vector<10x32xf32> to vector<1x32xf32>
    %46 = vector.broadcast %45 : vector<1x32xf32> to vector<16x32xf32>
    %47 = arith.addf %44, %46 : vector<16x32xf32>
    %c0_22 = arith.constant 0 : index
    %c3 = arith.constant 3 : index
    %c0_23 = arith.constant 0 : index
    %c0_24 = arith.constant 0 : index
    %48 = vector.load %arg3[%c0_22, %c3, %c0_23, %c0_24] : memref<1x6x32x32xf32, #tpu.memory_space<vmem>>, vector<1x1x32x32xf32>
    %49 = vector.shape_cast %48 : vector<1x1x32x32xf32> to vector<32x32xf32>
    %cst_25 = arith.constant 0.000000e+00 : f32
    %50 = vector.broadcast %cst_25 : f32 to vector<16x32xf32>
    %51 = vector.extract_strided_slice %35 {offsets = [0, 0], sizes = [16, 8], strides = [1, 1]} : vector<16x32xf32> to vector<16x8xf32>
    %52 = vector.shape_cast %51 : vector<16x8xf32> to vector<2x8x8xf32>
    %53 = vector.extract_strided_slice %41 {offsets = [0, 0], sizes = [16, 8], strides = [1, 1]} : vector<16x32xf32> to vector<16x8xf32>
    %54 = vector.shape_cast %53 : vector<16x8xf32> to vector<2x8x8xf32>
    %55 = vector.extract_strided_slice %47 {offsets = [0, 0], sizes = [16, 8], strides = [1, 1]} : vector<16x32xf32> to vector<16x8xf32>
    %56 = vector.shape_cast %55 : vector<16x8xf32> to vector<2x8x8xf32>
    "tpu.trace_start"() <{level = 10 : i32, message = "bqd,bkd->bqk"}> : () -> ()
    %cst_26 = arith.constant dense<0.000000e+00> : vector<2x8x8xf32>
    %57 = tpu.matmul %52, %54, %cst_26 {dimension_numbers = #tpu.dot_dimension_numbers<[2], [2], [1], [1], [0, 0, 0, 1, 1, 1], [0], [0]>} : vector<2x8x8xf32>, vector<2x8x8xf32>, vector<2x8x8xf32> -> vector<2x8x8xf32>
    "tpu.trace_stop"() : () -> ()
    %cst_27 = arith.constant 0.353553385 : f32
    %58 = vector.broadcast %cst_27 : f32 to vector<2x8x8xf32>
    %59 = arith.mulf %57, %58 : vector<2x8x8xf32>
    %cst_28 = arith.constant dense<0xFF800000> : vector<2x8xf32>
    %60 = vector.multi_reduction <maximumf>, %59, %cst_28 [2] : vector<2x8x8xf32> to vector<2x8xf32>
    %61 = vector.shape_cast %60 : vector<2x8xf32> to vector<2x8x1xf32>
    %62 = vector.broadcast %61 : vector<2x8x1xf32> to vector<2x8x8xf32>
    %63 = arith.subf %59, %62 : vector<2x8x8xf32>
    %64 = math.exp %63 : vector<2x8x8xf32>
    %cst_29 = arith.constant dense<0.000000e+00> : vector<2x8xf32>
    %65 = vector.multi_reduction <add>, %64, %cst_29 [2] : vector<2x8x8xf32> to vector<2x8xf32>
    %66 = vector.shape_cast %65 : vector<2x8xf32> to vector<2x8x1xf32>
    %67 = vector.broadcast %66 : vector<2x8x1xf32> to vector<2x8x8xf32>
    %68 = arith.divf %64, %67 : vector<2x8x8xf32>
    "tpu.trace_start"() <{level = 10 : i32, message = "bqk,bkd->bqd"}> : () -> ()
    %cst_30 = arith.constant dense<0.000000e+00> : vector<2x8x8xf32>
    %69 = tpu.matmul %68, %56, %cst_30 {dimension_numbers = #tpu.dot_dimension_numbers<[2], [1], [1], [2], [0, 0, 0, 1, 1, 2], [0], [0]>} : vector<2x8x8xf32>, vector<2x8x8xf32>, vector<2x8x8xf32> -> vector<2x8x8xf32>
    "tpu.trace_stop"() : () -> ()
    %70 = vector.shape_cast %69 : vector<2x8x8xf32> to vector<16x8xf32>
    %71 = vector.extract_strided_slice %49 {offsets = [0, 0], sizes = [8, 32], strides = [1, 1]} : vector<32x32xf32> to vector<8x32xf32>
    %cst_31 = arith.constant dense<0.000000e+00> : vector<16x32xf32>
    %72 = tpu.matmul %70, %71, %cst_31 {dimension_numbers = #tpu.dot_dimension_numbers<[1], [0], [0], [1], [0, 0, 1, 1], [], []>} : vector<16x8xf32>, vector<8x32xf32>, vector<16x32xf32> -> vector<16x32xf32>
    %73 = arith.addf %50, %72 : vector<16x32xf32>
    %74 = vector.extract_strided_slice %35 {offsets = [0, 8], sizes = [16, 8], strides = [1, 1]} : vector<16x32xf32> to vector<16x8xf32>
    %75 = vector.shape_cast %74 : vector<16x8xf32> to vector<2x8x8xf32>
    %76 = vector.extract_strided_slice %41 {offsets = [0, 8], sizes = [16, 8], strides = [1, 1]} : vector<16x32xf32> to vector<16x8xf32>
    %77 = vector.shape_cast %76 : vector<16x8xf32> to vector<2x8x8xf32>
    %78 = vector.extract_strided_slice %47 {offsets = [0, 8], sizes = [16, 8], strides = [1, 1]} : vector<16x32xf32> to vector<16x8xf32>
    %79 = vector.shape_cast %78 : vector<16x8xf32> to vector<2x8x8xf32>
    "tpu.trace_start"() <{level = 10 : i32, message = "bqd,bkd->bqk"}> : () -> ()
    %cst_32 = arith.constant dense<0.000000e+00> : vector<2x8x8xf32>
    %80 = tpu.matmul %75, %77, %cst_32 {dimension_numbers = #tpu.dot_dimension_numbers<[2], [2], [1], [1], [0, 0, 0, 1, 1, 1], [0], [0]>} : vector<2x8x8xf32>, vector<2x8x8xf32>, vector<2x8x8xf32> -> vector<2x8x8xf32>
    "tpu.trace_stop"() : () -> ()
    %cst_33 = arith.constant 0.353553385 : f32
    %81 = vector.broadcast %cst_33 : f32 to vector<2x8x8xf32>
    %82 = arith.mulf %80, %81 : vector<2x8x8xf32>
    %cst_34 = arith.constant dense<0xFF800000> : vector<2x8xf32>
    %83 = vector.multi_reduction <maximumf>, %82, %cst_34 [2] : vector<2x8x8xf32> to vector<2x8xf32>
    %84 = vector.shape_cast %83 : vector<2x8xf32> to vector<2x8x1xf32>
    %85 = vector.broadcast %84 : vector<2x8x1xf32> to vector<2x8x8xf32>
    %86 = arith.subf %82, %85 : vector<2x8x8xf32>
    %87 = math.exp %86 : vector<2x8x8xf32>
    %cst_35 = arith.constant dense<0.000000e+00> : vector<2x8xf32>
    %88 = vector.multi_reduction <add>, %87, %cst_35 [2] : vector<2x8x8xf32> to vector<2x8xf32>
    %89 = vector.shape_cast %88 : vector<2x8xf32> to vector<2x8x1xf32>
    %90 = vector.broadcast %89 : vector<2x8x1xf32> to vector<2x8x8xf32>
    %91 = arith.divf %87, %90 : vector<2x8x8xf32>
    "tpu.trace_start"() <{level = 10 : i32, message = "bqk,bkd->bqd"}> : () -> ()
    %cst_36 = arith.constant dense<0.000000e+00> : vector<2x8x8xf32>
    %92 = tpu.matmul %91, %79, %cst_36 {dimension_numbers = #tpu.dot_dimension_numbers<[2], [1], [1], [2], [0, 0, 0, 1, 1, 2], [0], [0]>} : vector<2x8x8xf32>, vector<2x8x8xf32>, vector<2x8x8xf32> -> vector<2x8x8xf32>
    "tpu.trace_stop"() : () -> ()
    %93 = vector.shape_cast %92 : vector<2x8x8xf32> to vector<16x8xf32>
    %94 = vector.extract_strided_slice %49 {offsets = [8, 0], sizes = [8, 32], strides = [1, 1]} : vector<32x32xf32> to vector<8x32xf32>
    %cst_37 = arith.constant dense<0.000000e+00> : vector<16x32xf32>
    %95 = tpu.matmul %93, %94, %cst_37 {dimension_numbers = #tpu.dot_dimension_numbers<[1], [0], [0], [1], [0, 0, 1, 1], [], []>} : vector<16x8xf32>, vector<8x32xf32>, vector<16x32xf32> -> vector<16x32xf32>
    %96 = arith.addf %73, %95 : vector<16x32xf32>
    %97 = vector.extract_strided_slice %35 {offsets = [0, 16], sizes = [16, 8], strides = [1, 1]} : vector<16x32xf32> to vector<16x8xf32>
    %98 = vector.shape_cast %97 : vector<16x8xf32> to vector<2x8x8xf32>
    %99 = vector.extract_strided_slice %41 {offsets = [0, 16], sizes = [16, 8], strides = [1, 1]} : vector<16x32xf32> to vector<16x8xf32>
    %100 = vector.shape_cast %99 : vector<16x8xf32> to vector<2x8x8xf32>
    %101 = vector.extract_strided_slice %47 {offsets = [0, 16], sizes = [16, 8], strides = [1, 1]} : vector<16x32xf32> to vector<16x8xf32>
    %102 = vector.shape_cast %101 : vector<16x8xf32> to vector<2x8x8xf32>
    "tpu.trace_start"() <{level = 10 : i32, message = "bqd,bkd->bqk"}> : () -> ()
    %cst_38 = arith.constant dense<0.000000e+00> : vector<2x8x8xf32>
    %103 = tpu.matmul %98, %100, %cst_38 {dimension_numbers = #tpu.dot_dimension_numbers<[2], [2], [1], [1], [0, 0, 0, 1, 1, 1], [0], [0]>} : vector<2x8x8xf32>, vector<2x8x8xf32>, vector<2x8x8xf32> -> vector<2x8x8xf32>
    "tpu.trace_stop"() : () -> ()
    %cst_39 = arith.constant 0.353553385 : f32
    %104 = vector.broadcast %cst_39 : f32 to vector<2x8x8xf32>
    %105 = arith.mulf %103, %104 : vector<2x8x8xf32>
    %cst_40 = arith.constant dense<0xFF800000> : vector<2x8xf32>
    %106 = vector.multi_reduction <maximumf>, %105, %cst_40 [2] : vector<2x8x8xf32> to vector<2x8xf32>
    %107 = vector.shape_cast %106 : vector<2x8xf32> to vector<2x8x1xf32>
    %108 = vector.broadcast %107 : vector<2x8x1xf32> to vector<2x8x8xf32>
    %109 = arith.subf %105, %108 : vector<2x8x8xf32>
    %110 = math.exp %109 : vector<2x8x8xf32>
    %cst_41 = arith.constant dense<0.000000e+00> : vector<2x8xf32>
    %111 = vector.multi_reduction <add>, %110, %cst_41 [2] : vector<2x8x8xf32> to vector<2x8xf32>
    %112 = vector.shape_cast %111 : vector<2x8xf32> to vector<2x8x1xf32>
    %113 = vector.broadcast %112 : vector<2x8x1xf32> to vector<2x8x8xf32>
    %114 = arith.divf %110, %113 : vector<2x8x8xf32>
    "tpu.trace_start"() <{level = 10 : i32, message = "bqk,bkd->bqd"}> : () -> ()
    %cst_42 = arith.constant dense<0.000000e+00> : vector<2x8x8xf32>
    %115 = tpu.matmul %114, %102, %cst_42 {dimension_numbers = #tpu.dot_dimension_numbers<[2], [1], [1], [2], [0, 0, 0, 1, 1, 2], [0], [0]>} : vector<2x8x8xf32>, vector<2x8x8xf32>, vector<2x8x8xf32> -> vector<2x8x8xf32>
    "tpu.trace_stop"() : () -> ()
    %116 = vector.shape_cast %115 : vector<2x8x8xf32> to vector<16x8xf32>
    %117 = vector.extract_strided_slice %49 {offsets = [16, 0], sizes = [8, 32], strides = [1, 1]} : vector<32x32xf32> to vector<8x32xf32>
    %cst_43 = arith.constant dense<0.000000e+00> : vector<16x32xf32>
    %118 = tpu.matmul %116, %117, %cst_43 {dimension_numbers = #tpu.dot_dimension_numbers<[1], [0], [0], [1], [0, 0, 1, 1], [], []>} : vector<16x8xf32>, vector<8x32xf32>, vector<16x32xf32> -> vector<16x32xf32>
    %119 = arith.addf %96, %118 : vector<16x32xf32>
    %120 = vector.extract_strided_slice %35 {offsets = [0, 24], sizes = [16, 8], strides = [1, 1]} : vector<16x32xf32> to vector<16x8xf32>
    %121 = vector.shape_cast %120 : vector<16x8xf32> to vector<2x8x8xf32>
    %122 = vector.extract_strided_slice %41 {offsets = [0, 24], sizes = [16, 8], strides = [1, 1]} : vector<16x32xf32> to vector<16x8xf32>
    %123 = vector.shape_cast %122 : vector<16x8xf32> to vector<2x8x8xf32>
    %124 = vector.extract_strided_slice %47 {offsets = [0, 24], sizes = [16, 8], strides = [1, 1]} : vector<16x32xf32> to vector<16x8xf32>
    %125 = vector.shape_cast %124 : vector<16x8xf32> to vector<2x8x8xf32>
    "tpu.trace_start"() <{level = 10 : i32, message = "bqd,bkd->bqk"}> : () -> ()
    %cst_44 = arith.constant dense<0.000000e+00> : vector<2x8x8xf32>
    %126 = tpu.matmul %121, %123, %cst_44 {dimension_numbers = #tpu.dot_dimension_numbers<[2], [2], [1], [1], [0, 0, 0, 1, 1, 1], [0], [0]>} : vector<2x8x8xf32>, vector<2x8x8xf32>, vector<2x8x8xf32> -> vector<2x8x8xf32>
    "tpu.trace_stop"() : () -> ()
    %cst_45 = arith.constant 0.353553385 : f32
    %127 = vector.broadcast %cst_45 : f32 to vector<2x8x8xf32>
    %128 = arith.mulf %126, %127 : vector<2x8x8xf32>
    %cst_46 = arith.constant dense<0xFF800000> : vector<2x8xf32>
    %129 = vector.multi_reduction <maximumf>, %128, %cst_46 [2] : vector<2x8x8xf32> to vector<2x8xf32>
    %130 = vector.shape_cast %129 : vector<2x8xf32> to vector<2x8x1xf32>
    %131 = vector.broadcast %130 : vector<2x8x1xf32> to vector<2x8x8xf32>
    %132 = arith.subf %128, %131 : vector<2x8x8xf32>
    %133 = math.exp %132 : vector<2x8x8xf32>
    %cst_47 = arith.constant dense<0.000000e+00> : vector<2x8xf32>
    %134 = vector.multi_reduction <add>, %133, %cst_47 [2] : vector<2x8x8xf32> to vector<2x8xf32>
    %135 = vector.shape_cast %134 : vector<2x8xf32> to vector<2x8x1xf32>
    %136 = vector.broadcast %135 : vector<2x8x1xf32> to vector<2x8x8xf32>
    %137 = arith.divf %133, %136 : vector<2x8x8xf32>
    "tpu.trace_start"() <{level = 10 : i32, message = "bqk,bkd->bqd"}> : () -> ()
    %cst_48 = arith.constant dense<0.000000e+00> : vector<2x8x8xf32>
    %138 = tpu.matmul %137, %125, %cst_48 {dimension_numbers = #tpu.dot_dimension_numbers<[2], [1], [1], [2], [0, 0, 0, 1, 1, 2], [0], [0]>} : vector<2x8x8xf32>, vector<2x8x8xf32>, vector<2x8x8xf32> -> vector<2x8x8xf32>
    "tpu.trace_stop"() : () -> ()
    %139 = vector.shape_cast %138 : vector<2x8x8xf32> to vector<16x8xf32>
    %140 = vector.extract_strided_slice %49 {offsets = [24, 0], sizes = [8, 32], strides = [1, 1]} : vector<32x32xf32> to vector<8x32xf32>
    %cst_49 = arith.constant dense<0.000000e+00> : vector<16x32xf32>
    %141 = tpu.matmul %139, %140, %cst_49 {dimension_numbers = #tpu.dot_dimension_numbers<[1], [0], [0], [1], [0, 0, 1, 1], [], []>} : vector<16x8xf32>, vector<8x32xf32>, vector<16x32xf32> -> vector<16x32xf32>
    %142 = arith.addf %119, %141 : vector<16x32xf32>
    %143 = arith.addf %3, %142 : vector<16x32xf32>
    %144 = vector.extract_strided_slice %5 {offsets = [3, 0], sizes = [1, 32], strides = [1, 1]} : vector<10x32xf32> to vector<1x32xf32>
    %145 = vector.broadcast %144 : vector<1x32xf32> to vector<16x32xf32>
    %146 = arith.addf %143, %145 : vector<16x32xf32>
    %147 = vector.extract_strided_slice %5 {offsets = [6, 0], sizes = [1, 32], strides = [1, 1]} : vector<10x32xf32> to vector<1x32xf32>
    %148 = vector.extract_strided_slice %5 {offsets = [7, 0], sizes = [1, 32], strides = [1, 1]} : vector<10x32xf32> to vector<1x32xf32>
    %cst_50 = arith.constant dense<0.000000e+00> : vector<16xf32>
    %149 = vector.multi_reduction <add>, %146, %cst_50 [1] : vector<16x32xf32> to vector<16xf32>
    %150 = vector.shape_cast %149 : vector<16xf32> to vector<16x1xf32>
    %cst_51 = arith.constant 3.200000e+01 : f32
    %151 = vector.broadcast %cst_51 : f32 to vector<16x1xf32>
    %152 = arith.divf %150, %151 : vector<16x1xf32>
    %153 = vector.broadcast %152 : vector<16x1xf32> to vector<16x32xf32>
    %154 = arith.subf %146, %153 : vector<16x32xf32>
    %155 = arith.mulf %154, %154 : vector<16x32xf32>
    %cst_52 = arith.constant dense<0.000000e+00> : vector<16xf32>
    %156 = vector.multi_reduction <add>, %155, %cst_52 [1] : vector<16x32xf32> to vector<16xf32>
    %157 = vector.shape_cast %156 : vector<16xf32> to vector<16x1xf32>
    %cst_53 = arith.constant 3.200000e+01 : f32
    %158 = vector.broadcast %cst_53 : f32 to vector<16x1xf32>
    %159 = arith.divf %157, %158 : vector<16x1xf32>
    %160 = vector.broadcast %152 : vector<16x1xf32> to vector<16x32xf32>
    %161 = arith.subf %146, %160 : vector<16x32xf32>
    %cst_54 = arith.constant 9.99999974E-6 : f32
    %162 = vector.broadcast %cst_54 : f32 to vector<16x1xf32>
    %163 = arith.addf %159, %162 : vector<16x1xf32>
    %164 = math.rsqrt %163 : vector<16x1xf32>
    %165 = vector.broadcast %164 : vector<16x1xf32> to vector<16x32xf32>
    %166 = arith.mulf %161, %165 : vector<16x32xf32>
    %167 = vector.broadcast %147 : vector<1x32xf32> to vector<16x32xf32>
    %168 = arith.mulf %166, %167 : vector<16x32xf32>
    %169 = vector.broadcast %148 : vector<1x32xf32> to vector<16x32xf32>
    %170 = arith.addf %168, %169 : vector<16x32xf32>
    %c0_55 = arith.constant 0 : index
    %c4 = arith.constant 4 : index
    %c0_56 = arith.constant 0 : index
    %c0_57 = arith.constant 0 : index
    %171 = vector.load %arg3[%c0_55, %c4, %c0_56, %c0_57] : memref<1x6x32x32xf32, #tpu.memory_space<vmem>>, vector<1x1x32x32xf32>
    %172 = vector.shape_cast %171 : vector<1x1x32x32xf32> to vector<32x32xf32>
    %cst_58 = arith.constant dense<0.000000e+00> : vector<16x32xf32>
    %173 = tpu.matmul %170, %172, %cst_58 {dimension_numbers = #tpu.dot_dimension_numbers<[1], [0], [0], [1], [0, 0, 1, 1], [], []>} : vector<16x32xf32>, vector<32x32xf32>, vector<16x32xf32> -> vector<16x32xf32>
    %174 = vector.extract_strided_slice %5 {offsets = [8, 0], sizes = [1, 32], strides = [1, 1]} : vector<10x32xf32> to vector<1x32xf32>
    %175 = vector.broadcast %174 : vector<1x32xf32> to vector<16x32xf32>
    %176 = arith.addf %173, %175 : vector<16x32xf32>
    %cst_59 = arith.constant 5.000000e-01 : f32
    %177 = vector.broadcast %cst_59 : f32 to vector<16x32xf32>
    %178 = arith.mulf %177, %176 : vector<16x32xf32>
    %cst_60 = arith.constant 1.41421354 : f32
    %179 = vector.broadcast %cst_60 : f32 to vector<16x32xf32>
    %180 = arith.divf %176, %179 : vector<16x32xf32>
    %181 = math.erf %180 : vector<16x32xf32>
    %cst_61 = arith.constant 1.000000e+00 : f32
    %182 = vector.broadcast %cst_61 : f32 to vector<16x32xf32>
    %183 = arith.addf %182, %181 : vector<16x32xf32>
    %184 = arith.mulf %178, %183 : vector<16x32xf32>
    %c0_62 = arith.constant 0 : index
    %c5 = arith.constant 5 : index
    %c0_63 = arith.constant 0 : index
    %c0_64 = arith.constant 0 : index
    %185 = vector.load %arg3[%c0_62, %c5, %c0_63, %c0_64] : memref<1x6x32x32xf32, #tpu.memory_space<vmem>>, vector<1x1x32x32xf32>
    %186 = vector.shape_cast %185 : vector<1x1x32x32xf32> to vector<32x32xf32>
    %cst_65 = arith.constant dense<0.000000e+00> : vector<16x32xf32>
    %187 = tpu.matmul %184, %186, %cst_65 {dimension_numbers = #tpu.dot_dimension_numbers<[1], [0], [0], [1], [0, 0, 1, 1], [], []>} : vector<16x32xf32>, vector<32x32xf32>, vector<16x32xf32> -> vector<16x32xf32>
    %188 = vector.extract_strided_slice %5 {offsets = [9, 0], sizes = [1, 32], strides = [1, 1]} : vector<10x32xf32> to vector<1x32xf32>
    %189 = vector.broadcast %188 : vector<1x32xf32> to vector<16x32xf32>
    %190 = arith.addf %187, %189 : vector<16x32xf32>
    %191 = arith.addf %146, %190 : vector<16x32xf32>
    %c0_66 = arith.constant 0 : index
    %c0_67 = arith.constant 0 : index
    %192 = vector.load %arg5[%c0_66, %c0_67] : memref<16x32xf32, #tpu.memory_space<vmem>>, vector<16x32xf32>
    tpu.vector_store %arg5[%c0_66, %c0_67], %191 {strides = array<i32>} : memref<16x32xf32, #tpu.memory_space<vmem>>, vector<16x32xf32>,
    return
  }
  func.func @transform_0(%arg0: i32) -> (i32, i32) {
    %c0_i32 = arith.constant 0 : i32
    %c0_i32_0 = arith.constant 0 : i32
    %c0_i32_1 = arith.constant 0 : i32
    return %c0_i32, %c0_i32_0 : i32, i32
  }
  func.func @transform_1(%arg0: i32) -> (i32, i32) {
    %c0_i32 = arith.constant 0 : i32
    %c0_i32_0 = arith.constant 0 : i32
    %c0_i32_1 = arith.constant 0 : i32
    return %c0_i32, %c0_i32_0 : i32, i32
  }
  func.func @transform_2(%arg0: i32) -> (i32, i32, i32, i32) {
    %c0_i32 = arith.constant 0 : i32
    %c0_i32_0 = arith.constant 0 : i32
    %c0_i32_1 = arith.constant 0 : i32
    %c0_i32_2 = arith.constant 0 : i32
    return %arg0, %c0_i32, %c0_i32_0, %c0_i32_1 : i32, i32, i32, i32
  }
  func.func @transform_3(%arg0: i32) -> (i32, i32, i32) {
    %c0_i32 = arith.constant 0 : i32
    %c0_i32_0 = arith.constant 0 : i32
    %c0_i32_1 = arith.constant 0 : i32
    return %arg0, %c0_i32, %c0_i32_0 : i32, i32, i32
  }
  func.func @transform_4(%arg0: i32) -> (i32, i32) {
    %c0_i32 = arith.constant 0 : i32
    %c0_i32_0 = arith.constant 0 : i32
    %c0_i32_1 = arith.constant 0 : i32
    return %c0_i32, %c0_i32_0 : i32, i32
  }
}

</mosaic_0001>

<bundles_post_ra>
// kernel: tpu_custom_call.1
= control target key start
LH: loop header
LB: loop body
LE: loop exit
PB: predicated region body
PF: predicated region fallthrough
CT: control target
= control target key end

     0   :  { %9 = vsyncpa [#allocation3], 0  ;;  %s2158_s0 = inlined_call_operand.vmem [shape: f32[16,32], index: 0, kind: input, shape index: {}]   ;;  %s2159_s1 = inlined_call_operand.vmem [shape: f32[2,32], index: 1, kind: input, shape index: {}]   ;;  %s2160_s2 = inlined_call_operand.hbm [shape: f32[2,6,32,32], index: 2, kind: input, shape index: {}]   ;;  %s2161_s3 = inlined_call_operand.vmem [shape: f32[2,10,32], index: 3, kind: input, shape index: {}]   ;;  %s2162_s4 = inlined_call_operand.hbm [shape: f32[16,32], index: 4, kind: output, shape index: {}]  }
   0x1   :  { %11 = vsyncpa [#allocation3 + $0x1], 0 }
   0x2   :  { %12 = vsyncpa [#allocation4], 0  ;;  %s1830_s15 = smov 0   ;;  %s1832_s16 = smov 0  }
   0x3   :  { %s1834_s17 = smov 0   ;;  %s1836_s18 = smov 0  }
   0x4 LB: > { %s1849_s19 = sadd.s32 4294967295, %s1792_s18   ;;  %s1852_s20 = sadd.s32 1, %s1792_s18   ;;  %s1792_s18 = sphi %s1836_s18, %s2168_s18   ;;  %s1788_s17 = sphi %s1834_s17, %s2167_s17   ;;  %s1784_s16 = sphi %s1832_s16, %s2166_s16   ;;  %s1780_s15 = sphi %s1830_s15, %s2165_s15  }
   0x5   : > { %s64_s21 = ssub.s32 %s1792_s18, %s1852_s20  ;;  %s67_s22 = sadd.s32 1, %s1788_s17 }
   0x6   : > { %p65_p0 = scmp.eq.s32.totalorder %s64_s21, 0  ;;  %p74_p1 = scmp.ne.s32.totalorder %s1788_s17, %s1784_s16 }
   0x7   : > { %p75_p2 = scmp.eq.s32.totalorder %s1792_s18, 0  ;;  %p80_p3 = scmp.ne.s32.totalorder %s1784_s16, %s1780_s15 }
   0x8   : > { %s1862_s23 = scalar_select %p65_p0, %s1788_s17, %s67_s22  }
   0x9   : > { %p76_p4 = por %p75_p2, %p74_p1  ;;  %p81_p5 = scmp.eq.s32.totalorder %s1849_s19, 0 }
   0xa   : > { %p1589_p6 = scmp.lt.s32.totalorder %s1792_s18, 2  ;;  %s157_s25 = sand.u32 1, %s1788_s17  }
   0xb   : > { %p1866_p7 = por %p81_p5, %p80_p3  ;;  %s1576_s26 = smul.u32 192, %s157_s25 }
   0xc   : > { %s1577_s27 = smul.u32 192, %s1792_s18  ;;  %p1872_p8 = pnand %p1589_p6, %p76_p4 }
   0xd   : > { %s161_s6 = scalar_lea.vmem [#allocation2], %s1576_s26  ;;  %p1499_p9 = scmp.ge.s32.totalorder %s1792_s18, 1 }
   0xe   : > { %s166_s5 = scalar_lea.hbm %s2160_s2, %s1577_s27  ;;  %s169_s7 = sshll.u32 %s161_s6, 4  ;;  %s170_s7 = int_to_ptr.vmem [resolvable:$true] %s169_s7 }
   0xf   : > { %s167_s8 = sshll.u32 %s166_s5, 4  ;;  %s158_s9 = scalar_lea.sflag [#allocation3], %s157_s25  ;;  %s168_s8 = int_to_ptr.hbm [resolvable:$true] %s167_s8 }
  0x10   : > { %s1696_s10 = sshra.s32 %s168_s8, 4  ;;  %p1700_p11 = pneg %p1872_p8  ;;  %s1697_s10 = int_to_ptr.hbm [resolvable:$true] %s1696_s10 }
  0x11   : > { %s1698_s11 = scalar_lea.hbm %s1697_s10, 192  ;;  %s1703_s14 = scalar_lea.hbm %s2160_s2, 384 }
  0x12   : > { %p1699_p10 = scmp.ne.s32.totalorder %s1697_s10, %s1698_s11  ;;  %p1704_p0 = scmp.lt.s32.totalorder %s1697_s10, %s2160_s2 }
  0x13   : > { %p1705_p1 = scmp.lt.s32.totalorder %s1703_s14, %s1698_s11 }
  0x14   : > { %p1701_p12 = pnand %p1700_p11, %p1699_p10 }
  0x15   : > { %p1706_p2 = por %p1705_p1, %p1704_p0 }
  0x16   : > { %p1702_p13 = pneg %p1701_p12 }
  0x18   : > { %p1707_p3 = pnand %p1706_p2, %p1702_p13 }
  0x1a   : > { %1710 = shalt.err (!%p1707_p3)
}
  0x1b   : > { %s1794_s22 = smov 128   ;;  %s1795_s25 = smov 8  }
  0x1c   : > { %1588 = dma.hbm_to_vmem [thread:$0]  (!%p1872_p8), %s168_s8, 3072, %s170_s7, %s158_s9, %s1794_s22, %s1794_s22, %s1795_s25  }
  0x1d   : > { %p185_p4 = scmp.lt.s32.totalorder %s1792_s18, 3 }
  0x1f   : > { %p186_p5 = pnand %p1499_p9, %p185_p4 }
  0x20   : > { %s191_s26 = sand.u32 (!%p186_p5), 1, %s1784_s16  }
  0x21   : > { %189 = sbr.rel (%p186_p5) target bundleno = 2896 (0xb50), region = 36  ;;  %s192_s29 = scalar_lea.sflag (!%p186_p5), [#allocation3], %s191_s26 }
  0x22   : > { %s1578_s27 = smul.u32 (!%p186_p5), 192, %s191_s26 }
  0x24   : > { %s1894_s30 = scalar_lea.vmem (!%p186_p5), [#allocation2], %s1578_s27 }
  0x26   : > { %1771 = dma.done.wait (%p1866_p7), %s192_s29, 3072  }
  0x27   : > { %1773 = vsyncadd (%p1866_p7), %s192_s29, 4294964224  ;;  %p221_p6 = scmp.lt.s32.totalorder %s1849_s19, 1  ;;  %p1502_p8 = scmp.ne.s32.totalorder %s1849_s19, 0 }
  0x29   : > { %s222_s28 = scalar_select %p221_p6, %s1849_s19, 1 }
  0x2a   : > { %229 = sbr.rel (%p1502_p8) target bundleno = 325 (0x145), region = 44 }
  0x2b   : > { %s1571_s5 = sshll.u32 %s222_s28, 4 }
  0x2c   : > { %s1905_s7 = scalar_lea.vmem %s2161_s3, %s1571_s5 }
  0x2f   : > { %v230_v0 = vld [vmem:[%s2158_s0] sm:$0xff]  ;;  %vm234_vm0 = vcmask 261120   ;;  %v231_v2 = vld [vmem:[%s2158_s0 + $0x8] sm:$0xff]  ;;  %v1796_v4 = vmov 32.0  }
  0x30   : > { %v235_v1 = vsel %vm234_vm0, %v230_v0, 0.0  ;;  %v238_v3 = vsel %vm234_vm0, %v231_v2, 0.0  ;;  %1637 = vrcp.f32 %v1796_v4  ;;  %v1635_v35 = vld [vmem:[%s2159_s1] ss:$0 sm:$0xff]  ;;  %v1636_v38 = vld [vmem:[%s2159_s1 + $0x1] ss:$0 sm:$0xff] }
  0x31   : > { %236 = vadd.xlane.f32.xlu0 %v235_v1 }
  0x36   : > { %v1638_v5 = vpop.eup %1637 }
  0x37   : > { %v242_v6 = vmul.f32 32.0, %v1638_v5  ;;  %vm246_vm1 = vweird.f32 %v1638_v5 }
  0x39   : > { %239 = vadd.xlane.f32.xlu0 %v238_v3  ;;  %v243_v7 = vsub.f32 1.0, %v242_v6 }
  0x3b   : > { %v244_v8 = vmul.f32 %v1638_v5, %v243_v7 }
  0x3d   : > { %v245_v9 = vadd.f32 %v1638_v5, %v244_v8 }
  0x3f   : > { %v247_v10 = vsel %vm246_vm1, %v1638_v5, %v245_v9 }
  0xa4   : > { %v237_v11 = vpop.xlane.xlu0 %236 }
  0xa5   : > { %v248_v12 = vmul.f32 %v247_v10, %v237_v11 }
  0xa7   : > { %v250_v13 = vsub.f32 %v230_v0, %v248_v12 }
  0xa9   : > { %v252_v14 = vmul.f32 %v250_v13, %v250_v13 }
  0xab   : > { %v254_v15 = vsel %vm234_vm0, %v252_v14, 0.0 }
  0xac   : > { %255 = vadd.xlane.f32.xlu1 %v254_v15  ;;  %v240_v16 = vpop.xlane.xlu0 %239 }
  0xad   : > { %v249_v17 = vmul.f32 %v247_v10, %v240_v16 }
  0xaf   : > { %v251_v18 = vsub.f32 %v231_v2, %v249_v17 }
  0xb1   : > { %v253_v19 = vmul.f32 %v251_v18, %v251_v18 }
  0xb3   : > { %v257_v20 = vsel %vm234_vm0, %v253_v19, 0.0 }
  0xb4   : > { %258 = vadd.xlane.f32.xlu1 %v257_v20 }
 0x11f   : > { %v256_v21 = vpop.xlane.xlu1 %255 }
 0x120   : > { %v260_v22 = vmul.f32 %v256_v21, %v247_v10 }
 0x122   : > { %v262_v23 = vadd.f32 1e-12, %v260_v22 }
 0x124   : > { %1639 = vrsqrt.f32 %v262_v23  ;;  %vm270_vm3 = vweird.f32 %v262_v23 }
 0x127   : > { %v259_v24 = vpop.xlane.xlu1 %258 }
 0x128   : > { %v261_v25 = vmul.f32 %v259_v24, %v247_v10 }
 0x12a   : > { %v1640_v26 = vpop.eup %1639  ;;  %v263_v27 = vadd.f32 1e-12, %v261_v25 }
 0x12b   : > { %v265_v28 = vmul.f32 %v1640_v26, %v262_v23  ;;  %vm271_vm2 = vweird.f32 %v1640_v26 }
 0x12c   : > { %1641 = vrsqrt.f32 %v263_v27  ;;  %vm272_vm4 = vmor %vm270_vm3, %vm271_vm2  ;;  %vm280_vm6 = vweird.f32 %v263_v27 }
 0x12d   : > { %v266_v29 = vmul.f32 %v1640_v26, %v265_v28 }
 0x12f   : > { %v267_v30 = vmul.f32 0.5, %v266_v29 }
 0x131   : > { %v268_v31 = vsub.f32 1.5, %v267_v30 }
 0x132   : > { %v1642_v32 = vpop.eup %1641 }
 0x133   : > { %v269_v33 = vmul.f32 %v1640_v26, %v268_v31  ;;  %v275_v34 = vmul.f32 %v1642_v32, %v263_v27  ;;  %vm281_vm5 = vweird.f32 %v1642_v32 }
 0x134   : > { %vm282_vm7 = vmor %vm280_vm6, %vm281_vm5 }
 0x135   : > { %v273_v36 = vsel %vm272_vm4, %v1640_v26, %v269_v33  ;;  %v276_v37 = vmul.f32 %v1642_v32, %v275_v34 }
 0x136   : > { %v284_v39 = vmul.f32 %v273_v36, %v250_v13 }
 0x137   : > { %v277_v40 = vmul.f32 0.5, %v276_v37 }
 0x138   : > { %v287_v41 = vmul.f32 %v1635_v35, %v284_v39 }
 0x139   : > { %v278_v42 = vsub.f32 1.5, %v277_v40 }
 0x13a   : > { %v290_v43 = vadd.f32 %v1636_v38, %v287_v41 }
 0x13b   : > { %v279_v44 = vmul.f32 %v1642_v32, %v278_v42 }
 0x13c   : > { %292 = vst.msk [vmem:[#allocation5] sm:$0xff] %vm234_vm0, %v290_v43 }
 0x13d   : > { %v283_v45 = vsel %vm282_vm7, %v1642_v32, %v279_v44 }
 0x13e   : > { %v285_v46 = vmul.f32 %v283_v45, %v251_v18 }
 0x140   : > { %v288_v47 = vmul.f32 %v1635_v35, %v285_v46 }
 0x142   : > { %v291_v48 = vadd.f32 %v1636_v38, %v288_v47 }
 0x144   : > { %293 = vst.msk [vmem:[#allocation5 + $0x8] sm:$0xff] %vm234_vm0, %v291_v48 }
 0x145 PF: > { %vm298_vm8 = vcmask 261120   ;;  %v1928_v50 = vld [vmem:[#allocation5] sm:$0xff]  ;;  %v1797_v53 = vmov 32.0   ;;  %v359_v6 = vld [vmem:[%s1894_s30 + $0x18] sm:$0xff]  ;;  %v358_v8 = vld [vmem:[%s1894_s30 + $0x10] sm:$0xff]  ;;  %vm453_vm0 = vcmask 64512  }
 0x146   : > { %v299_v52 = vsel %vm298_vm8, %v1928_v50, 0.0  ;;  %1648 = vrcp.f32 %v1797_v53  ;;  %v1508_v7 = vld [vmem:[%s1894_s30 + $0x38] sm:$0xff]  ;;  %379 = vmatpush.msra.mxu0 %v359_v6  ;;  %1572 = vmatpush.msra.mxu2 %v359_v6  ;;  %v1507_v9 = vld [vmem:[%s1894_s30 + $0x30] sm:$0xff]  ;;  %v357_v10 = vld [vmem:[%s1894_s30 + $0x8] sm:$0xff]  ;;  %s1798_s15 = smov 120   ;;  %s1799_s21 = smov 112  }
 0x147   : > { %300 = vadd.xlane.f32.xlu0 %v299_v52  ;;  %408 = vmatpush.msra.mxu1 %v1508_v7  ;;  %v1506_v11 = vld [vmem:[%s1894_s30 + $0x28] sm:$0xff]  ;;  %v356_v12 = vld [vmem:[%s1894_s30] sm:$0xff]  ;;  %v1514_v14 = vld [vmem:[%s1894_s30 + $0x58] sm:$0xff]  ;;  %s1800_s22 = smov 104   ;;  %s1802_s25 = smov [#allocation5]  }
 0x148   : > { %380 = vmatpush.msra.mxu0 %v358_v8  ;;  %1573 = vmatpush.msra.mxu2 %v358_v8  ;;  %v1505_v13 = vld [vmem:[%s1894_s30 + $0x20] sm:$0xff]  ;;  %v1513_v15 = vld [vmem:[%s1894_s30 + $0x50] sm:$0xff]  ;;  %v1512_v18 = vld [vmem:[%s1894_s30 + $0x48] sm:$0xff]  ;;  %s1427_s26 = sshll.u32 %s1802_s25, 4  ;;  %p1590_p7 = scmp.eq.s32.totalorder %s1849_s19, 1  ;;  %s1428_s26 = int_to_ptr.vmem [resolvable:$true] %s1427_s26 }
 0x149   : > { %409 = vmatpush.msra.mxu1 %v1507_v9  ;;  %v1511_v21 = vld [vmem:[%s1894_s30 + $0x40] sm:$0xff]  ;;  %s1803_s28 = smov 128   ;;  %s1804_s5 = smov 8  }
 0x14a   : > { %381 = vmatpush.msra.mxu0 %v357_v10  ;;  %1574 = vmatpush.msra.mxu2 %v357_v10  ;;  %v1965_v33 = vld [vmem:[%s1905_s7] sm:$0xff] }
 0x14b   : > { %v1926_v49 = vld [vmem:[#allocation5 + $0x8] sm:$0xff]  ;;  %410 = vmatpush.msra.mxu1 %v1506_v11  ;;  %v350_v37 = vperm.slane %v1965_v33, 4  ;;  %v353_v40 = vperm.slane %v1965_v33, 5  ;;  %v395_v47 = vperm.slane %v1965_v33, 1  ;;  %v360_v48 = vperm.slane %v1965_v33, 0 }
 0x14c   : > { %v302_v51 = vsel %vm298_vm8, %v1926_v49, 0.0  ;;  %v1649_v54 = vpop.eup %1648  ;;  %382 = vmatpush.msra.mxu0 %v356_v12  ;;  %1575 = vmatpush.msra.mxu2 %v356_v12 }
 0x14d   : > { %303 = vadd.xlane.f32.xlu1 %v302_v51  ;;  %v306_v55 = vmul.f32 32.0, %v1649_v54  ;;  %vm310_vm9 = vweird.f32 %v1649_v54  ;;  %411 = vmatpush.msra.mxu1 %v1505_v13 }
 0x14e   : > { %437 = vmatpush.msrb.mxu2 %v1514_v14 }
 0x14f   : > { %v307_v56 = vsub.f32 1.0, %v306_v55 }
 0x150   : > { %438 = vmatpush.msrb.mxu2 %v1513_v15 }
 0x151   : > { %v308_v57 = vmul.f32 %v1649_v54, %v307_v56 }
 0x152   : > { %439 = vmatpush.msrb.mxu2 %v1512_v18 }
 0x153   : > { %v309_v58 = vadd.f32 %v1649_v54, %v308_v57 }
 0x154   : > { %440 = vmatpush.msrb.mxu2 %v1511_v21 }
 0x155   : > { %v1934_v59 = vsel %vm310_vm9, %v1649_v54, %v309_v58 }
 0x1ba   : > { %v301_v61 = vpop.xlane.xlu0 %300 }
 0x1bb   : > { %v312_v63 = vmul.f32 %v1934_v59, %v301_v61 }
 0x1bd   : > { %v1942_v1 = vsub.f32 %v1928_v50, %v312_v63 }
 0x1bf   : > { %v316_v3 = vmul.f32 %v1942_v1, %v1942_v1 }
 0x1c0   : > { %v304_v60 = vpop.xlane.xlu1 %303 }
 0x1c1   : > { %v313_v62 = vmul.f32 %v1934_v59, %v304_v60  ;;  %v318_v5 = vsel %vm298_vm8, %v316_v3, 0.0  ;;  %v424_v60 = vperm.slane %v1965_v33, 2 }
 0x1c2   : > { %319 = vadd.xlane.f32.xlu0 %v318_v5 }
 0x1c3   : > { %v1939_v0 = vsub.f32 %v1926_v49, %v313_v62 }
 0x1c5   : > { %v317_v2 = vmul.f32 %v1939_v0, %v1939_v0 }
 0x1c7   : > { %v321_v4 = vsel %vm298_vm8, %v317_v2, 0.0 }
 0x1c8   : > { %322 = vadd.xlane.f32.xlu1 %v321_v4 }
 0x235   : > { %v320_v17 = vpop.xlane.xlu0 %319 }
 0x236   : > { %v324_v20 = vmul.f32 %v320_v17, %v1934_v59 }
 0x238   : > { %v326_v23 = vadd.f32 1e-05, %v324_v20 }
 0x23a   : > { %vm334_vm14 = vweird.f32 %v326_v23 }
 0x23b   : > { %v323_v16 = vpop.xlane.xlu1 %322 }
 0x23c   : > { %v325_v19 = vmul.f32 %v323_v16, %v1934_v59 }
 0x23e   : > { %v327_v22 = vadd.f32 1e-05, %v325_v19 }
 0x240   : > { %1650 = vrsqrt.f32 %v327_v22  ;;  %vm344_vm10 = vweird.f32 %v327_v22 }
 0x241   : > { %1652 = vrsqrt.f32 %v326_v23 }
 0x246   : > { %v1651_v24 = vpop.eup %1650 }
 0x247   : > { %v1653_v25 = vpop.eup %1652  ;;  %v339_v26 = vmul.f32 %v1651_v24, %v327_v22  ;;  %vm345_vm11 = vweird.f32 %v1651_v24 }
 0x248   : > { %v329_v27 = vmul.f32 %v1653_v25, %v326_v23  ;;  %vm346_vm12 = vmor %vm344_vm10, %vm345_vm11  ;;  %vm335_vm13 = vweird.f32 %v1653_v25 }
 0x249   : > { %v340_v28 = vmul.f32 %v1651_v24, %v339_v26  ;;  %vm336_vm15 = vmor %vm334_vm14, %vm335_vm13 }
 0x24a   : > { %v330_v29 = vmul.f32 %v1653_v25, %v329_v27 }
 0x24b   : > { %v341_v30 = vmul.f32 0.5, %v340_v28 }
 0x24c   : > { %v331_v31 = vmul.f32 0.5, %v330_v29 }
 0x24d   : > { %v342_v32 = vsub.f32 1.5, %v341_v30 }
 0x24e   : > { %v332_v34 = vsub.f32 1.5, %v331_v31 }
 0x24f   : > { %v343_v35 = vmul.f32 %v1651_v24, %v342_v32 }
 0x250   : > { %v333_v36 = vmul.f32 %v1653_v25, %v332_v34 }
 0x251   : > { %v347_v38 = vsel %vm346_vm12, %v1651_v24, %v343_v35  ;;  %v1517_v24 = vld [vmem:[%s1894_s30 + $0x60] sm:$0xff] }
 0x252   : > { %v337_v39 = vsel %vm336_vm15, %v1653_v25, %v333_v36  ;;  %v349_v41 = vmul.f32 %v347_v38, %v1939_v0 }
 0x253   : > { %v348_v42 = vmul.f32 %v337_v39, %v1942_v1 }
 0x254   : > { %v352_v43 = vmul.f32 %v350_v37, %v349_v41 }
 0x255   : > { %v351_v44 = vmul.f32 %v350_v37, %v348_v42 }
 0x256   : > { %v355_v45 = vadd.f32 %v353_v40, %v352_v43 }
 0x257   : > { %v354_v46 = vadd.f32 %v353_v40, %v351_v44 }
 0x258   : > { %1504 = vmatmul.msk.f32.vlgmr.msra.gmra.mxu2 %vm298_vm8, %v355_v45 }
 0x259   : > { %1503 = vmatmul.msk.f32.vlgmr.msra.gmra.mxu0 %vm298_vm8, %v354_v46  ;;  %1509 = vmatmul.msk.f32.vlgmr.msra.gmra.mxu1 %vm298_vm8, %v354_v46 }
 0x260   : > { %1515 = vmatmul.msk.f32.vlgmr.msrb.gmra.mxu2 %vm298_vm8, %v354_v46 }
 0x261   : > { %1510 = vmatmul.msk.f32.gmra.mxu1 %vm298_vm8, %v355_v45 }
 0x268   : > { %1516 = vmatmul.msk.f32.gmra.mxu2 %vm298_vm8, %v355_v45 }
 0x2d6   : > { %v413_v51 = vpop.f32.mrf.mxu1  ;;  %v384_v52 = vpop.f32.mrf.mxu0 }
 0x2d7   : > { %v1979_v53 = vadd.f32 %v413_v51, %v395_v47  ;;  %v1985_v54 = vadd.f32 %v384_v52, %v360_v48 }
 0x2d9   : > { %604 = vrot.lane.b32.xlu2 %v1979_v53, %s1798_s15  ;;  %1521 = vmatpush.xpose.msk.msra.mxu3 %vm453_vm0, %v1979_v53 }
 0x2db   : > { %v387_v55 = vpop.f32.mrf.mxu2 }
 0x2dc   : > { %1522 = vmatmul.msk.f32.vlgmr.msra.gmra.mxu3 %vm453_vm0, %v1985_v54  ;;  %v1991_v58 = vadd.f32 %v387_v55, %v360_v48 }
 0x2de   : > { %v416_v56 = vpop.f32.mrf.mxu1 }
 0x2df   : > { %v1989_v57 = vadd.f32 %v416_v56, %v395_v47 }
 0x2e1   : > { %602 = vrot.lane.b32.xlu2 %v1985_v54, %s1798_s15  ;;  %1523 = vmatpush.xpose.msk.msrb.mxu3 %vm453_vm0, %v1989_v57 }
 0x2e3   : > { %v442_v61 = vpop.f32.mrf.mxu2 }
 0x2e4   : > { %v1998_v62 = vadd.f32 %v442_v61, %v424_v60  ;;  %1524 = vmatmul.msk.f32.vlgmr.msrb.gmra.mxu3 %vm453_vm0, %v1991_v58 }
 0x2e6   : > { %574 = vmatpush.msra.mxu3 %v1998_v62 }
 0x2eb   : > { %v445_v63 = vpop.f32.mrf.mxu2 }
 0x2ec   : > { %v2003_v0 = vadd.f32 %v445_v63, %v424_v60 }
 0x2ee   : > { %597 = vmatpush.msrb.mxu0 %v2003_v0 }
 0x333   : > { %v605_v1 = vpop.permute.xlu2 %604 }
 0x334   : > { %1527 = vmatpush.xpose.msk.msrb.mxu1 %vm453_vm0, %v605_v1 }
 0x33b   : > { %v603_v2 = vpop.permute.xlu2 %602 }
 0x33c   : > { %1528 = vmatmul.msk.f32.vlgmr.msrb.gmra.mxu1 %vm453_vm0, %v603_v2 }
 0x35f   : > { %v477_v3 = vpop.f32.mrf.mxu3 }
 0x360   : > { %v506_v4 = vmul.f32 0.35355338, %v477_v3 }
 0x362   : > { %v508_v5 = vsel %vm453_vm0, %v506_v4, -inf }
 0x363   : > { %509 = vmax.xlane.f32.xlu0 %v508_v5 }
 0x367   : > { %v503_v14 = vpop.f32.mrf.mxu3 }
 0x368   : > { %v507_v15 = vmul.f32 0.35355338, %v503_v14 }
 0x36a   : > { %v511_v17 = vsel %vm453_vm0, %v507_v15, -inf }
 0x377   : > { %632 = vrot.lane.b32.xlu0 %v1989_v57, %s1798_s15 }
 0x3b9   : > { %v627_v6 = vpop.f32.mrf.mxu1 }
 0x3ba   : > { %v658_v7 = vmul.f32 0.35355338, %v627_v6 }
 0x3bc   : > { %v660_v8 = vsel %vm453_vm0, %v658_v7, -inf }
 0x3bd   : > { %661 = vmax.xlane.f32.xlu1 %v660_v8 }
 0x3d6   : > { %709 = vrot.lane.b32.xlu1 %v1998_v62, %s1798_s15  ;;  %v510_v9 = vpop.xlane.xlu0 %509 }
 0x3d7   : > { %v514_v10 = vsub.f32 %v506_v4, %v510_v9 }
 0x3d9   : > { %v516_v11 = vmul.f32 1.442695, %v514_v10 }
 0x3db   : > { %1654 = vpow2.f32 %v516_v11 }
 0x3de   : > { %630 = vrot.lane.b32.xlu1 %v1991_v58, %s1798_s15 }
 0x3e1   : > { %v1655_v12 = vpop.eup %1654 }
 0x3e2   : > { %v520_v13 = vsel %vm453_vm0, %v1655_v12, 0.0 }
 0x3e3   : > { %521 = vadd.xlane.f32.xlu2 %v520_v13 }
 0x3e6   : > { %820 = vrot.lane.b32.xlu1 %v1985_v54, %s1799_s21 }
 0x3e9   : > { %v633_v16 = vpop.permute.xlu0 %632 }
 0x3ea   : > { %1529 = vmatpush.xpose.msk.msra.mxu2 %vm453_vm0, %v633_v16 }
 0x3eb   : > { %512 = vmax.xlane.f32.xlu2 %v511_v17 }
 0x3ee   : > { %812 = vmatpush.msrb.mxu2 %v1517_v24 }
 0x403   : > { %736 = vrot.lane.b32.xlu2 %v2003_v0, %s1798_s15 }
 0x40b   : > { %1011 = vrot.lane.b32.xlu2 %v1979_v53, %s1800_s22 }
 0x430   : > { %v662_v18 = vpop.xlane.xlu1 %661 }
 0x431   : > { %v666_v19 = vsub.f32 %v658_v7, %v662_v18 }
 0x433   : > { %v668_v20 = vmul.f32 1.442695, %v666_v19 }
 0x435   : > { %1656 = vpow2.f32 %v668_v20 }
 0x43b   : > { %v1657_v21 = vpop.eup %1656 }
 0x43c   : > { %v672_v22 = vsel %vm453_vm0, %v1657_v21, 0.0 }
 0x43d   : > { %673 = vadd.xlane.f32.xlu0 %v672_v22 }
 0x448   : > { %v710_v23 = vpop.permute.xlu1 %709 }
 0x449   : > { %730 = vmatpush.msrb.mxu3 %v710_v23 }
 0x450   : > { %v631_v25 = vpop.permute.xlu1 %630 }
 0x451   : > { %822 = vrot.lane.b32.xlu0 %v1979_v53, %s1799_s21  ;;  %1530 = vmatmul.msk.f32.vlgmr.msra.gmra.mxu2 %vm453_vm0, %v631_v25 }
 0x456   : > { %v522_v26 = vpop.xlane.xlu2 %521 }
 0x457   : > { %1658 = vrcp.f32 %v522_v26  ;;  %v537_v31 = vand.u32 2147483648, %v522_v26  ;;  %v535_v34 = vand.u32 2147483647, %v522_v26  ;;  %vm531_vm2 = vweird.f32 %v522_v26 }
 0x458   : > { %v821_v3 = vpop.permute.xlu1 %820 }
 0x459   : > { %v538_v36 = vor.u32 1.1754944e-38, %v537_v31  ;;  %vm536_vm4 = vcmp.eq.f32.partialorder %v535_v34, 8.507059e+37 }
 0x45d   : > { %v1659_v27 = vpop.eup %1658 }
 0x45e   : > { %v527_v28 = vmul.f32 %v1659_v27, %v522_v26  ;;  %v513_v29 = vpop.xlane.xlu2 %512  ;;  %vm532_vm1 = vweird.f32 %v1659_v27 }
 0x45f   : > { %vm533_vm3 = vmor %vm531_vm2, %vm532_vm1  ;;  %v515_v41 = vsub.f32 %v507_v15, %v513_v29 }
 0x460   : > { %v528_v30 = vsub.f32 1.0, %v527_v28 }
 0x461   : > { %v518_v42 = vmul.f32 1.442695, %v515_v41 }
 0x462   : > { %v529_v32 = vmul.f32 %v1659_v27, %v528_v30 }
 0x463   : > { %1660 = vpow2.f32 %v518_v42 }
 0x464   : > { %v530_v35 = vadd.f32 %v1659_v27, %v529_v32 }
 0x466   : > { %v534_v37 = vsel %vm533_vm3, %v1659_v27, %v530_v35  ;;  %v737_v38 = vpop.permute.xlu2 %736 }
 0x467   : > { %v539_v39 = vsel %vm536_vm4, %v538_v36, %v534_v37  ;;  %757 = vmatpush.msra.mxu0 %v737_v38 }
 0x468   : > { %v540_v40 = vmul.f32 %v1655_v12, %v539_v39 }
 0x469   : > { %v1661_v44 = vpop.eup %1660 }
 0x46a   : > { %1525 = vmatmul.msk.f32.vlgmr.msra.gmra.mxu3 %vm453_vm0, %v540_v40  ;;  %v523_v45 = vsel %vm453_vm0, %v1661_v44, 0.0 }
 0x46e   : > { %v1012_v43 = vpop.permute.xlu2 %1011 }
 0x46f   : > { %1545 = vmatpush.xpose.msk.msra.mxu2 %vm453_vm0, %v1012_v43 }
 0x47b   : > { %524 = vadd.xlane.f32.xlu0 %v523_v45 }
 0x48f   : > { %926 = vrot.lane.b32.xlu0 %v1998_v62, %s1799_s21 }
 0x497   : > { %1039 = vrot.lane.b32.xlu0 %v1989_v57, %s1800_s22 }
 0x49f   : > { %1037 = vrot.lane.b32.xlu0 %v1991_v58, %s1800_s22 }
 0x4b0   : > { %v674_v46 = vpop.xlane.xlu0 %673 }
 0x4b1   : > { %1662 = vrcp.f32 %v674_v46  ;;  %v689_v52 = vand.u32 2147483648, %v674_v46  ;;  %v687_v55 = vand.u32 2147483647, %v674_v46  ;;  %vm683_vm6 = vweird.f32 %v674_v46 }
 0x4b3   : > { %v690_v60 = vor.u32 1.1754944e-38, %v689_v52  ;;  %vm688_vm9 = vcmp.eq.f32.partialorder %v687_v55, 8.507059e+37 }
 0x4b7   : > { %v1663_v47 = vpop.eup %1662 }
 0x4b8   : > { %v679_v48 = vmul.f32 %v1663_v47, %v674_v46  ;;  %vm684_vm5 = vweird.f32 %v1663_v47 }
 0x4b9   : > { %vm685_vm7 = vmor %vm683_vm6, %vm684_vm5 }
 0x4ba   : > { %v680_v51 = vsub.f32 1.0, %v679_v48 }
 0x4bc   : > { %v681_v53 = vmul.f32 %v1663_v47, %v680_v51 }
 0x4be   : > { %v682_v56 = vadd.f32 %v1663_v47, %v681_v53 }
 0x4c0   : > { %v686_v61 = vsel %vm685_vm7, %v1663_v47, %v682_v56 }
 0x4c1   : > { %v691_v63 = vsel %vm688_vm9, %v690_v60, %v686_v61 }
 0x4c2   : > { %v692_v1 = vmul.f32 %v1657_v21, %v691_v63  ;;  %v1518_v21 = vld [vmem:[%s1894_s30 + $0x68] sm:$0xff] }
 0x4c3   : > { %v823_v2 = vpop.permute.xlu0 %822  ;;  %783 = vmatpush.msra.mxu1 %v1518_v21 }
 0x4c4   : > { %1531 = vmatmul.msk.f32.vlgmr.msrb.gmra.mxu3 %vm453_vm0, %v692_v1 }
 0x4c5   : > { %1537 = vmatpush.xpose.msk.msra.mxu3 %vm453_vm0, %v823_v2 }
 0x4cc   : > { %1538 = vmatmul.msk.f32.vlgmr.msra.gmra.mxu3 %vm453_vm0, %v821_v3 }
 0x4d4   : > { %v655_v4 = vpop.f32.mrf.mxu2 }
 0x4d5   : > { %v659_v5 = vmul.f32 0.35355338, %v655_v4 }
 0x4d7   : > { %v663_v6 = vsel %vm453_vm0, %v659_v5, -inf }
 0x4d8   : > { %664 = vmax.xlane.f32.xlu1 %v663_v6 }
 0x4ed   : > { %v576_v7 = vpop.f32.mrf.mxu3 }
 0x4ee   : > { %1535 = vmatmul.msk.f32.vlgmr.msrb.gmra.mxu2 %vm453_vm0, %v576_v7  ;;  %v525_v8 = vpop.xlane.xlu0 %524 }
 0x4ef   : > { %1664 = vrcp.f32 %v525_v8  ;;  %v552_v12 = vand.u32 2147483648, %v525_v8  ;;  %v550_v14 = vand.u32 2147483647, %v525_v8  ;;  %vm546_vm11 = vweird.f32 %v525_v8 }
 0x4f1   : > { %850 = vrot.lane.b32.xlu1 %v1989_v57, %s1799_s21  ;;  %v553_v16 = vor.u32 1.1754944e-38, %v552_v12  ;;  %vm551_vm13 = vcmp.eq.f32.partialorder %v550_v14, 8.507059e+37  ;;  %v1519_v12 = vld [vmem:[%s1894_s30 + $0x70] sm:$0xff] }
 0x4f2   : > { %999 = vmatpush.msrb.mxu1 %v1519_v12 }
 0x4f5   : > { %v1665_v9 = vpop.eup %1664 }
 0x4f6   : > { %v542_v10 = vmul.f32 %v1665_v9, %v525_v8  ;;  %vm547_vm10 = vweird.f32 %v1665_v9 }
 0x4f7   : > { %vm548_vm12 = vmor %vm546_vm11, %vm547_vm10 }
 0x4f8   : > { %v543_v11 = vsub.f32 1.0, %v542_v10 }
 0x4fa   : > { %v544_v13 = vmul.f32 %v1665_v9, %v543_v11 }
 0x4fc   : > { %v545_v15 = vadd.f32 %v1665_v9, %v544_v13 }
 0x4fe   : > { %v549_v17 = vsel %vm548_vm12, %v1665_v9, %v545_v15 }
 0x4ff   : > { %v554_v18 = vsel %vm551_vm13, %v553_v16, %v549_v17 }
 0x500   : > { %v555_v19 = vmul.f32 %v1661_v44, %v554_v18 }
 0x501   : > { %v927_v20 = vpop.permute.xlu0 %926 }
 0x502   : > { %1526 = vmatmul.msk.f32.vlgmr.msrb.gmra.mxu0 %vm453_vm0, %v555_v19  ;;  %947 = vmatpush.msrb.mxu3 %v927_v20 }
 0x509   : > { %v1040_v57 = vpop.permute.xlu0 %1039 }
 0x50a   : > { %1547 = vmatpush.xpose.msk.msra.mxu3 %vm453_vm0, %v1040_v57 }
 0x511   : > { %v1038_v11 = vpop.permute.xlu0 %1037 }
 0x547   : > { %v732_v22 = vpop.f32.mrf.mxu3 }
 0x548   : > { %1533 = vmatmul.msk.f32.vlgmr.msra.gmra.mxu1 %vm453_vm0, %v732_v22 }
 0x54b   : > { %v665_v23 = vpop.xlane.xlu1 %664 }
 0x54c   : > { %v667_v24 = vsub.f32 %v659_v5, %v665_v23 }
 0x54e   : > { %v670_v25 = vmul.f32 1.442695, %v667_v24 }
 0x54f   : > { %v845_v28 = vpop.f32.mrf.mxu3 }
 0x550   : > { %1666 = vpow2.f32 %v670_v25  ;;  %v876_v29 = vmul.f32 0.35355338, %v845_v28 }
 0x552   : > { %v878_v30 = vsel %vm453_vm0, %v876_v29, -inf }
 0x556   : > { %v1667_v26 = vpop.eup %1666 }
 0x557   : > { %v675_v27 = vsel %vm453_vm0, %v1667_v26, 0.0 }
 0x558   : > { %676 = vadd.xlane.f32.xlu2 %v675_v27 }
 0x560   : > { %879 = vmax.xlane.f32.xlu2 %v878_v30 }
 0x563   : > { %v851_v31 = vpop.permute.xlu1 %850 }
 0x564   : > { %1539 = vmatpush.xpose.msk.msrb.mxu0 %vm453_vm0, %v851_v31 }
 0x571   : > { %v2067_v13 = vpop.f32.mrf.mxu2 }
 0x578   : > { %848 = vrot.lane.b32.xlu2 %v1991_v58, %s1799_s21 }
 0x57f   : > { %v599_v32 = vpop.f32.mrf.mxu0 }
 0x580   : > { %1536 = vmatmul.msk.f32.gmra.mxu2 %vm453_vm0, %v599_v32 }
 0x5cb   : > { %v677_v34 = vpop.xlane.xlu2 %676 }
 0x5cc   : > { %1668 = vrcp.f32 %v677_v34  ;;  %v704_v40 = vand.u32 2147483648, %v677_v34  ;;  %v702_v43 = vand.u32 2147483647, %v677_v34  ;;  %vm698_vm15 = vweird.f32 %v677_v34 }
 0x5ce   : > { %v705_v58 = vor.u32 1.1754944e-38, %v704_v40  ;;  %vm703_vm2 = vcmp.eq.f32.partialorder %v702_v43, 8.507059e+37 }
 0x5d2   : > { %v1669_v35 = vpop.eup %1668 }
 0x5d3   : > { %v694_v36 = vmul.f32 %v1669_v35, %v677_v34  ;;  %v880_v37 = vpop.xlane.xlu2 %879  ;;  %vm699_vm14 = vweird.f32 %v1669_v35 }
 0x5d4   : > { %v884_v38 = vsub.f32 %v876_v29, %v880_v37  ;;  %vm700_vm1 = vmor %vm698_vm15, %vm699_vm14 }
 0x5d5   : > { %v695_v39 = vsub.f32 1.0, %v694_v36 }
 0x5d6   : > { %v886_v41 = vmul.f32 1.442695, %v884_v38 }
 0x5d7   : > { %v696_v42 = vmul.f32 %v1669_v35, %v695_v39 }
 0x5d8   : > { %1670 = vpow2.f32 %v886_v41 }
 0x5d9   : > { %v697_v44 = vadd.f32 %v1669_v35, %v696_v42 }
 0x5db   : > { %v701_v45 = vsel %vm700_vm1, %v1669_v35, %v697_v44  ;;  %v849_v52 = vpop.permute.xlu2 %848 }
 0x5dc   : > { %v706_v46 = vsel %vm703_vm2, %v705_v58, %v701_v45 }
 0x5dd   : > { %v707_v47 = vmul.f32 %v1667_v26, %v706_v46 }
 0x5de   : > { %v1671_v48 = vpop.eup %1670 }
 0x5df   : > { %1532 = vmatmul.msk.f32.vlgmr.msra.gmra.mxu0 %vm453_vm0, %v707_v47  ;;  %v890_v51 = vsel %vm453_vm0, %v1671_v48, 0.0 }
 0x5e0   : > { %891 = vadd.xlane.f32.xlu2 %v890_v51  ;;  %v1643_v51 = vpack.i.bf16 %v2003_v0, %v1998_v62 }
 0x5e7   : > { %1540 = vmatmul.msk.f32.vlgmr.msrb.gmra.mxu0 %vm453_vm0, %v849_v52 }
 0x5f8   : > { %1009 = vrot.lane.b32.xlu2 %v1985_v54, %s1800_s22 }
 0x603   : > { %v2069_v14 = vpop.f32.mrf.mxu2 }
 0x653   : > { %v892_v53 = vpop.xlane.xlu2 %891 }
 0x654   : > { %1672 = vrcp.f32 %v892_v53  ;;  %v907_v1 = vand.u32 2147483648, %v892_v53  ;;  %v905_v3 = vand.u32 2147483647, %v892_v53  ;;  %vm901_vm4 = vweird.f32 %v892_v53 }
 0x656   : > { %v908_v54 = vor.u32 1.1754944e-38, %v907_v1  ;;  %vm906_vm6 = vcmp.eq.f32.partialorder %v905_v3, 8.507059e+37 }
 0x65a   : > { %v1673_v55 = vpop.eup %1672 }
 0x65b   : > { %v897_v56 = vmul.f32 %v1673_v55, %v892_v53  ;;  %v1010_v60 = vpop.permute.xlu2 %1009  ;;  %vm902_vm3 = vweird.f32 %v1673_v55 }
 0x65c   : > { %v759_v61 = vpop.f32.mrf.mxu0  ;;  %1546 = vmatmul.msk.f32.vlgmr.msra.gmra.mxu2 %vm453_vm0, %v1010_v60  ;;  %vm903_vm5 = vmor %vm901_vm4, %vm902_vm3 }
 0x65d   : > { %v898_v63 = vsub.f32 1.0, %v897_v56  ;;  %1534 = vmatmul.msk.f32.gmra.mxu1 %vm453_vm0, %v759_v61 }
 0x65f   : > { %v899_v2 = vmul.f32 %v1673_v55, %v898_v63 }
 0x661   : > { %v900_v4 = vadd.f32 %v1673_v55, %v899_v2 }
 0x663   : > { %v904_v5 = vsel %vm903_vm5, %v1673_v55, %v900_v4 }
 0x664   : > { %v909_v6 = vsel %vm906_vm6, %v908_v54, %v904_v5  ;;  %v873_v7 = vpop.f32.mrf.mxu0 }
 0x665   : > { %v877_v8 = vmul.f32 0.35355338, %v873_v7  ;;  %v910_v9 = vmul.f32 %v1671_v48, %v909_v6 }
 0x667   : > { %1541 = vmatmul.msk.f32.vlgmr.msrb.gmra.mxu3 %vm453_vm0, %v910_v9  ;;  %v881_v10 = vsel %vm453_vm0, %v877_v8, -inf }
 0x668   : > { %882 = vmax.xlane.f32.xlu1 %v881_v10 }
 0x66f   : > { %1548 = vmatmul.msk.f32.vlgmr.msra.gmra.mxu3 %vm453_vm0, %v1038_v11 }
 0x6db   : > { %v883_v15 = vpop.xlane.xlu1 %882 }
 0x6dc   : > { %v885_v16 = vsub.f32 %v877_v8, %v883_v15 }
 0x6de   : > { %v888_v17 = vmul.f32 1.442695, %v885_v16 }
 0x6df   : > { %v1034_v18 = vpop.f32.mrf.mxu2 }
 0x6e0   : > { %1674 = vpow2.f32 %v888_v17  ;;  %v1065_v19 = vmul.f32 0.35355338, %v1034_v18 }
 0x6e2   : > { %v1067_v20 = vsel %vm453_vm0, %v1065_v19, -inf }
 0x6e3   : > { %1068 = vmax.xlane.f32.xlu2 %v1067_v20 }
 0x6e6   : > { %v1675_v57 = vpop.eup %1674 }
 0x6e7   : > { %v893_v21 = vsel %vm453_vm0, %v1675_v57, 0.0 }
 0x6e8   : > { %894 = vadd.xlane.f32.xlu1 %v893_v21 }
 0x6ea   : > { %v949_v22 = vpop.f32.mrf.mxu3 }
 0x6eb   : > { %1543 = vmatmul.msk.f32.vlgmr.msrb.gmra.mxu1 %vm453_vm0, %v949_v22 }
 0x6f2   : > { %v1062_v23 = vpop.f32.mrf.mxu3 }
 0x6f3   : > { %v1066_v24 = vmul.f32 0.35355338, %v1062_v23  ;;  %v785_v23 = vpop.f32.mrf.mxu1 }
 0x6f5   : > { %v1070_v25 = vsel %vm453_vm0, %v1066_v24, -inf }
 0x6f6   : > { %1071 = vmax.xlane.f32.xlu0 %v1070_v25 }
 0x701   : > { %952 = vrot.lane.b32.xlu1 %v2003_v0, %s1799_s21 }
 0x756   : > { %v1069_v26 = vpop.xlane.xlu2 %1068 }
 0x757   : > { %v1073_v27 = vsub.f32 %v1065_v19, %v1069_v26  ;;  %v815_v26 = vadd.f32 %v2067_v13, %v785_v23 }
 0x759   : > { %v1075_v28 = vmul.f32 1.442695, %v1073_v27 }
 0x75b   : > { %1676 = vpow2.f32 %v1075_v28  ;;  %v895_v29 = vpop.xlane.xlu1 %894 }
 0x75c   : > { %1678 = vrcp.f32 %v895_v29  ;;  %v922_v39 = vand.u32 2147483648, %v895_v29  ;;  %vm916_vm9 = vweird.f32 %v895_v29  ;;  %v920_v41 = vand.u32 2147483647, %v895_v29 }
 0x75e   : > { %v923_v44 = vor.u32 1.1754944e-38, %v922_v39  ;;  %vm921_vm11 = vcmp.eq.f32.partialorder %v920_v41, 8.507059e+37 }
 0x761   : > { %v1677_v30 = vpop.eup %1676 }
 0x762   : > { %v1679_v31 = vpop.eup %1678  ;;  %v1079_v32 = vsel %vm453_vm0, %v1677_v30, 0.0 }
 0x763   : > { %v912_v34 = vmul.f32 %v1679_v31, %v895_v29  ;;  %1080 = vadd.xlane.f32.xlu2 %v1079_v32  ;;  %vm917_vm7 = vweird.f32 %v1679_v31 }
 0x764   : > { %vm918_vm10 = vmor %vm916_vm9, %vm917_vm7 }
 0x765   : > { %v913_v35 = vsub.f32 1.0, %v912_v34 }
 0x767   : > { %v914_v36 = vmul.f32 %v1679_v31, %v913_v35 }
 0x769   : > { %v915_v37 = vadd.f32 %v1679_v31, %v914_v36  ;;  %v1072_v38 = vpop.xlane.xlu0 %1071 }
 0x76a   : > { %v1074_v40 = vsub.f32 %v1066_v24, %v1072_v38  ;;  %v788_v24 = vpop.f32.mrf.mxu1 }
 0x76b   : > { %v919_v43 = vsel %vm918_vm10, %v1679_v31, %v915_v37  ;;  %v818_v36 = vadd.f32 %v2069_v14, %v788_v24 }
 0x76c   : > { %v1077_v42 = vmul.f32 1.442695, %v1074_v40  ;;  %v924_v58 = vsel %vm921_vm11, %v923_v44, %v919_v43 }
 0x76d   : > { %v925_v46 = vmul.f32 %v1675_v57, %v924_v58  ;;  %v1520_v57 = vld [vmem:[%s1894_s30 + $0x78] sm:$0xff] }
 0x76e   : > { %1680 = vpow2.f32 %v1077_v42  ;;  %1188 = vmatpush.msrb.mxu3 %v1520_v57 }
 0x772   : > { %v1001_v25 = vpop.f32.mrf.mxu1 }
 0x773   : > { %v953_v45 = vpop.permute.xlu1 %952  ;;  %v1007_v27 = vadd.f32 %v1001_v25, %v815_v26  ;;  %v2119_v25 = vld [vmem:[%s1905_s7 + $0x8] sm:$0x3] }
 0x774   : > { %v1681_v47 = vpop.eup %1680  ;;  %973 = vmatpush.msra.mxu0 %v953_v45 }
 0x775   : > { %1542 = vmatmul.msk.f32.vlgmr.msra.gmra.mxu0 %vm453_vm0, %v925_v46  ;;  %v1082_v48 = vsel %vm453_vm0, %v1681_v47, 0.0 }
 0x776   : > { %1083 = vadd.xlane.f32.xlu0 %v1082_v48  ;;  %v1556_v48 = vld [vmem:[%s1894_s30 + $0x98] sm:$0xff] }
 0x77b   : > { %1644 = vrot.lane.b32.xlu2 %v1643_v51, %s1800_s22  ;;  %v1555_v51 = vld [vmem:[%s1894_s30 + $0x90] sm:$0xff] }
 0x7d6   : > { %v1081_v52 = vpop.xlane.xlu2 %1080 }
 0x7d7   : > { %1682 = vrcp.f32 %v1081_v52  ;;  %v1096_v1 = vand.u32 2147483648, %v1081_v52  ;;  %v1094_v3 = vand.u32 2147483647, %v1081_v52  ;;  %vm1090_vm13 = vweird.f32 %v1081_v52 }
 0x7d9   : > { %v1097_v62 = vor.u32 1.1754944e-38, %v1096_v1  ;;  %vm1095_vm15 = vcmp.eq.f32.partialorder %v1094_v3, 8.507059e+37 }
 0x7dd   : > { %v1683_v53 = vpop.eup %1682 }
 0x7de   : > { %v1086_v55 = vmul.f32 %v1683_v53, %v1081_v52  ;;  %v1645_v56 = vpop.permute.xlu2 %1644  ;;  %vm1091_vm12 = vweird.f32 %v1683_v53  ;;  %v1554_v52 = vld [vmem:[%s1894_s30 + $0x88] sm:$0xff] }
 0x7df   : > { %v1647_v60 = vunpack.i.h.bf16 %v1645_v56  ;;  %v1646_v61 = vunpack.i.l.bf16 %v1645_v56  ;;  %vm1092_vm14 = vmor %vm1090_vm13, %vm1091_vm12 }
 0x7e0   : > { %v1087_v63 = vsub.f32 1.0, %v1086_v55 }
 0x7e1   : > { %1136 = vmatpush.msrb.mxu0 %v1646_v61  ;;  %1162 = vmatpush.msrb.mxu2 %v1647_v60 }
 0x7e2   : > { %v1088_v2 = vmul.f32 %v1683_v53, %v1087_v63 }
 0x7e3   : > { %1277 = vmatpush.msra.mxu0 %v1556_v48 }
 0x7e4   : > { %v1089_v4 = vadd.f32 %v1683_v53, %v1088_v2 }
 0x7e5   : > { %1278 = vmatpush.msra.mxu0 %v1555_v51 }
 0x7e6   : > { %v1093_v0 = vsel %vm1092_vm14, %v1683_v53, %v1089_v4  ;;  %v1553_v53 = vld [vmem:[%s1894_s30 + $0x80] sm:$0xff] }
 0x7e7   : > { %v1098_v54 = vsel %vm1095_vm15, %v1097_v62, %v1093_v0  ;;  %1279 = vmatpush.msra.mxu0 %v1554_v52  ;;  %v1247_v62 = vperm.slane %v1965_v33, 6 }
 0x7e8   : > { %v1099_v5 = vmul.f32 %v1677_v30, %v1098_v54  ;;  %v1200_v30 = vperm.slane %v1965_v33, 3 }
 0x7e9   : > { %v1084_v6 = vpop.xlane.xlu0 %1083  ;;  %1280 = vmatpush.msra.mxu0 %v1553_v53 }
 0x7ea   : > { %1684 = vrcp.f32 %v1084_v6  ;;  %1549 = vmatmul.msk.f32.vlgmr.msrb.gmra.mxu0 %vm453_vm0, %v1099_v5  ;;  %v1111_v11 = vand.u32 2147483648, %v1084_v6  ;;  %v1109_v15 = vand.u32 2147483647, %v1084_v6  ;;  %vm1105_vm2 = vweird.f32 %v1084_v6 }
 0x7eb   : > { %v1250_v5 = vperm.slane %v1965_v33, 7 }
 0x7ec   : > { %v1112_v17 = vor.u32 1.1754944e-38, %v1111_v11  ;;  %vm1110_vm4 = vcmp.eq.f32.partialorder %v1109_v15, 8.507059e+37 }
 0x7f0   : > { %v1685_v7 = vpop.eup %1684 }
 0x7f1   : > { %v1101_v8 = vmul.f32 %v1685_v7, %v1084_v6  ;;  %vm1106_vm1 = vweird.f32 %v1685_v7 }
 0x7f2   : > { %v975_v9 = vpop.f32.mrf.mxu0  ;;  %vm1107_vm3 = vmor %vm1105_vm2, %vm1106_vm1 }
 0x7f3   : > { %v1102_v10 = vsub.f32 1.0, %v1101_v8  ;;  %1544 = vmatmul.msk.f32.gmra.mxu1 %vm453_vm0, %v975_v9 }
 0x7f5   : > { %v1103_v12 = vmul.f32 %v1685_v7, %v1102_v10 }
 0x7f7   : > { %v1104_v16 = vadd.f32 %v1685_v7, %v1103_v12 }
 0x7f9   : > { %v1108_v18 = vsel %vm1107_vm3, %v1685_v7, %v1104_v16 }
 0x7fa   : > { %v1113_v19 = vsel %vm1110_vm4, %v1112_v17, %v1108_v18 }
 0x7fb   : > { %v1114_v20 = vmul.f32 %v1681_v47, %v1113_v19 }
 0x7fd   : > { %1550 = vmatmul.msk.f32.vlgmr.msrb.gmra.mxu2 %vm453_vm0, %v1114_v20 }
 0x867   : > { %v1138_v21 = vpop.f32.mrf.mxu0 }
 0x868   : > { %1551 = vmatmul.msk.f32.vlgmr.msrb.gmra.mxu3 %vm453_vm0, %v1138_v21 }
 0x870   : > { %v1004_v35 = vpop.f32.mrf.mxu1 }
 0x871   : > { %v1008_v37 = vadd.f32 %v1004_v35, %v818_v36 }
 0x880   : > { %v1164_v22 = vpop.f32.mrf.mxu2 }
 0x881   : > { %1552 = vmatmul.msk.f32.gmra.mxu3 %vm453_vm0, %v1164_v22 }
 0x8eb   : > { %v1190_v28 = vpop.f32.mrf.mxu3 }
 0x8ec   : > { %v1196_v29 = vadd.f32 %v1190_v28, %v1007_v27  ;;  %v1258_v27 = vperm.slane %v2119_v25, 0 }
 0x8ee   : > { %v1198_v31 = vadd.f32 %v1196_v29, %v1928_v50 }
 0x8f0   : > { %v2092_v32 = vadd.f32 %v1200_v30, %v1198_v31 }
 0x8f2   : > { %v1203_v34 = vsel %vm298_vm8, %v2092_v32, 0.0 }
 0x8f3   : > { %1204 = vadd.xlane.f32.xlu0 %v1203_v34 }
 0x904   : > { %v1193_v38 = vpop.f32.mrf.mxu3 }
 0x905   : > { %v1197_v39 = vadd.f32 %v1193_v38, %v1008_v37 }
 0x907   : > { %v1199_v13 = vadd.f32 %v1197_v39, %v1926_v49 }
 0x909   : > { %v2098_v40 = vadd.f32 %v1200_v30, %v1199_v13 }
 0x90b   : > { %v1206_v50 = vsel %vm298_vm8, %v2098_v40, 0.0 }
 0x90c   : > { %1207 = vadd.xlane.f32.xlu0 %v1206_v50 }
 0x966   : > { %v1205_v41 = vpop.xlane.xlu0 %1204 }
 0x967   : > { %v1209_v42 = vmul.f32 %v1205_v41, %v1934_v59 }
 0x969   : > { %v1211_v43 = vsub.f32 %v2092_v32, %v1209_v42 }
 0x96b   : > { %v1213_v14 = vmul.f32 %v1211_v43, %v1211_v43 }
 0x96d   : > { %v1215_v44 = vsel %vm298_vm8, %v1213_v14, 0.0 }
 0x96e   : > { %1216 = vadd.xlane.f32.xlu0 %v1215_v44  ;;  %v1563_v44 = vld [vmem:[%s1894_s30 + $0xb0] sm:$0xff] }
 0x97f   : > { %v1208_v49 = vpop.xlane.xlu0 %1207 }
 0x980   : > { %v1210_v58 = vmul.f32 %v1208_v49, %v1934_v59 }
 0x982   : > { %v1212_v45 = vsub.f32 %v2098_v40, %v1210_v58 }
 0x984   : > { %v1214_v46 = vmul.f32 %v1212_v45, %v1212_v45 }
 0x986   : > { %v1218_v47 = vsel %vm298_vm8, %v1214_v46, 0.0 }
 0x987   : > { %1219 = vadd.xlane.f32.xlu1 %v1218_v47  ;;  %v1561_v47 = vld [vmem:[%s1894_s30 + $0xa0] sm:$0xff] }
 0x9e1   : > { %v1217_v55 = vpop.xlane.xlu0 %1216 }
 0x9e2   : > { %v1221_v56 = vmul.f32 %v1217_v55, %v1934_v59 }
 0x9e4   : > { %v1223_v60 = vadd.f32 1e-05, %v1221_v56 }
 0x9e6   : > { %1686 = vrsqrt.f32 %v1223_v60  ;;  %vm1231_vm5 = vweird.f32 %v1223_v60 }
 0x9ec   : > { %v1687_v61 = vpop.eup %1686 }
 0x9ed   : > { %v1226_v63 = vmul.f32 %v1687_v61, %v1223_v60  ;;  %vm1232_vm0 = vweird.f32 %v1687_v61 }
 0x9ee   : > { %vm1233_vm6 = vmor %vm1231_vm5, %vm1232_vm0 }
 0x9ef   : > { %v1227_v1 = vmul.f32 %v1687_v61, %v1226_v63 }
 0x9f1   : > { %v1228_v2 = vmul.f32 0.5, %v1227_v1 }
 0x9f3   : > { %v1229_v3 = vsub.f32 1.5, %v1228_v2 }
 0x9f5   : > { %v1230_v4 = vmul.f32 %v1687_v61, %v1229_v3 }
 0x9f7   : > { %v1234_v0 = vsel %vm1233_vm6, %v1687_v61, %v1230_v4 }
 0x9f8   : > { %v1245_v54 = vmul.f32 %v1234_v0, %v1211_v43  ;;  %v1564_v43 = vld [vmem:[%s1894_s30 + $0xb8] sm:$0xff] }
 0x9f9   : > { %1407 = vmatpush.msra.mxu1 %v1564_v43 }
 0x9fa   : > { %v1248_v6 = vmul.f32 %v1247_v62, %v1245_v54  ;;  %v1220_v7 = vpop.xlane.xlu1 %1219 }
 0x9fb   : > { %v1222_v8 = vmul.f32 %v1220_v7, %v1934_v59  ;;  %v1801_v59 = vmov 1.4142135   ;;  %1408 = vmatpush.msra.mxu1 %v1563_v44 }
 0x9fc   : > { %v1251_v9 = vadd.f32 %v1250_v5, %v1248_v6 }
 0x9fd   : > { %v1224_v10 = vadd.f32 1e-05, %v1222_v8 }
 0x9fe   : > { %1557 = vmatmul.msk.f32.vlgmr.msra.gmra.mxu0 %vm298_vm8, %v1251_v9 }
 0x9ff   : > { %1688 = vrsqrt.f32 %v1224_v10  ;;  %vm1241_vm9 = vweird.f32 %v1224_v10 }
 0xa00   : > { %1690 = vrcp.f32 %v1801_v59 }
 0xa05   : > { %v1689_v11 = vpop.eup %1688 }
 0xa06   : > { %v1236_v12 = vmul.f32 %v1689_v11, %v1224_v10  ;;  %vm1242_vm7 = vweird.f32 %v1689_v11  ;;  %v1691_v21 = vpop.eup %1690 }
 0xa07   : > { %vm1243_vm10 = vmor %vm1241_vm9, %vm1242_vm7  ;;  %v1291_v22 = vmul.f32 1.4142135, %v1691_v21  ;;  %vm1295_vm11 = vweird.f32 %v1691_v21 }
 0xa08   : > { %v1237_v15 = vmul.f32 %v1689_v11, %v1236_v12 }
 0xa09   : > { %v1292_v23 = vsub.f32 1.0, %v1291_v22 }
 0xa0a   : > { %v1238_v16 = vmul.f32 0.5, %v1237_v15 }
 0xa0b   : > { %v1293_v24 = vmul.f32 %v1691_v21, %v1292_v23 }
 0xa0c   : > { %v1239_v17 = vsub.f32 1.5, %v1238_v16 }
 0xa0d   : > { %v1294_v26 = vadd.f32 %v1691_v21, %v1293_v24 }
 0xa0e   : > { %v1240_v18 = vmul.f32 %v1689_v11, %v1239_v17 }
 0xa0f   : > { %v1296_v29 = vsel %vm1295_vm11, %v1691_v21, %v1294_v26 }
 0xa10   : > { %v1244_v33 = vsel %vm1243_vm10, %v1689_v11, %v1240_v18 }
 0xa11   : > { %v1246_v19 = vmul.f32 %v1244_v33, %v1212_v45  ;;  %v1562_v45 = vld [vmem:[%s1894_s30 + $0xa8] sm:$0xff]  ;;  %s1429_s30 = sshll.u32 %s2162_s4, 4  ;;  %s1430_s30 = int_to_ptr.hbm [resolvable:$true] %s1429_s30 }
 0xa12   : > { %1409 = vmatpush.msra.mxu1 %v1562_v45 }
 0xa13   : > { %v1249_v20 = vmul.f32 %v1247_v62, %v1246_v19 }
 0xa14   : > { %1410 = vmatpush.msra.mxu1 %v1561_v47 }
 0xa15   : > { %v1252_v57 = vadd.f32 %v1250_v5, %v1249_v20 }
 0xa17   : > { %1558 = vmatmul.msk.f32.gmra.mxu0 %vm298_vm8, %v1252_v57 }
 0xa7b   : > { %v1282_v28 = vpop.f32.mrf.mxu0 }
 0xa7c   : > { %v2122_v30 = vadd.f32 %v1282_v28, %v1258_v27 }
 0xa7e   : > { %v1297_v31 = vmul.f32 %v1296_v29, %v2122_v30 }
 0xa80   : > { %v1299_v34 = vmul.f32 %v1297_v31, %v1297_v31 }
 0xa82   : > { %v1300_v35 = vmin.f32 %v1299_v34, 16.0 }
 0xa84   : > { %v1301_v36 = vmul.f32 2.1237322e-06, %v1300_v35  ;;  %v1312_v37 = vmul.f32 3.8918573e-05, %v1300_v35 }
 0xa86   : > { %v1302_v38 = vadd.f32 0.00028619796, %v1301_v36  ;;  %v1313_v39 = vadd.f32 0.001143296, %v1312_v37 }
 0xa88   : > { %v1303_v13 = vmul.f32 %v1302_v38, %v1300_v35  ;;  %v1314_v50 = vmul.f32 %v1313_v39, %v1300_v35 }
 0xa8a   : > { %v1304_v41 = vadd.f32 0.0036580483, %v1303_v13  ;;  %v1315_v42 = vadd.f32 0.014752088, %v1314_v50 }
 0xa8c   : > { %v1316_v14 = vmul.f32 %v1315_v42, %v1300_v35  ;;  %v1305_v49 = vmul.f32 %v1304_v41, %v1300_v35 }
 0xa8e   : > { %v1317_v58 = vadd.f32 0.112945676, %v1316_v14  ;;  %v1306_v48 = vadd.f32 0.05243302, %v1305_v49 }
 0xa90   : > { %v1318_v46 = vmul.f32 %v1317_v58, %v1300_v35  ;;  %v1307_v56 = vmul.f32 %v1306_v48, %v1300_v35 }
 0xa92   : > { %v1319_v51 = vadd.f32 0.4994258, %v1318_v46  ;;  %v1308_v1 = vadd.f32 0.18741608, %v1307_v56  ;;  %v1388_v56 = vperm.slane %v2119_v25, 1 }
 0xa94   : > { %v1320_v52 = vmul.f32 %v1319_v51, %v1300_v35  ;;  %v1285_v53 = vpop.f32.mrf.mxu0  ;;  %v1309_v0 = vmul.f32 %v1308_v1, %v1300_v35 }
 0xa95   : > { %v2129_v55 = vadd.f32 %v1285_v53, %v1258_v27 }
 0xa96   : > { %v1321_v60 = vadd.f32 1.0, %v1320_v52  ;;  %v1310_v10 = vadd.f32 1.1283791, %v1309_v0 }
 0xa97   : > { %v1298_v61 = vmul.f32 %v1296_v29, %v2129_v55  ;;  %v1288_v29 = vmul.f32 0.5, %v2122_v30  ;;  %v1289_v51 = vmul.f32 0.5, %v2129_v55 }
 0xa98   : > { %1692 = vrcp.f32 %v1321_v60  ;;  %v1333_v11 = vand.u32 2147483648, %v1321_v60  ;;  %v1331_v15 = vand.u32 2147483647, %v1321_v60  ;;  %vm1327_vm13 = vweird.f32 %v1321_v60 }
 0xa99   : > { %v1339_v63 = vmul.f32 %v1298_v61, %v1298_v61  ;;  %v1311_v20 = vmul.f32 %v1310_v10, %v1297_v31 }
 0xa9a   : > { %v1334_v19 = vor.u32 1.1754944e-38, %v1333_v11  ;;  %vm1332_vm15 = vcmp.eq.f32.partialorder %v1331_v15, 8.507059e+37 }
 0xa9b   : > { %v1340_v2 = vmin.f32 %v1339_v63, 16.0 }
 0xa9d   : > { %v1341_v3 = vmul.f32 2.1237322e-06, %v1340_v2  ;;  %v1352_v4 = vmul.f32 3.8918573e-05, %v1340_v2 }
 0xa9e   : > { %v1693_v62 = vpop.eup %1692 }
 0xa9f   : > { %v1323_v54 = vmul.f32 %v1693_v62, %v1321_v60  ;;  %v1342_v5 = vadd.f32 0.00028619796, %v1341_v3  ;;  %v1353_v6 = vadd.f32 0.001143296, %v1352_v4  ;;  %vm1328_vm12 = vweird.f32 %v1693_v62 }
 0xaa0   : > { %vm1329_vm14 = vmor %vm1327_vm13, %vm1328_vm12 }
 0xaa1   : > { %v1324_v7 = vsub.f32 1.0, %v1323_v54  ;;  %v1343_v8 = vmul.f32 %v1342_v5, %v1340_v2  ;;  %v1354_v9 = vmul.f32 %v1353_v6, %v1340_v2 }
 0xaa3   : > { %v1325_v12 = vmul.f32 %v1693_v62, %v1324_v7  ;;  %v1355_v16 = vadd.f32 0.014752088, %v1354_v9  ;;  %v1344_v17 = vadd.f32 0.0036580483, %v1343_v8 }
 0xaa5   : > { %v1326_v18 = vadd.f32 %v1693_v62, %v1325_v12  ;;  %v1356_v33 = vmul.f32 %v1355_v16, %v1340_v2  ;;  %v1345_v22 = vmul.f32 %v1344_v17, %v1340_v2 }
 0xaa7   : > { %v1330_v57 = vsel %vm1329_vm14, %v1693_v62, %v1326_v18  ;;  %v1357_v59 = vadd.f32 0.112945676, %v1356_v33  ;;  %v1346_v28 = vadd.f32 0.05243302, %v1345_v22 }
 0xaa8   : > { %v1335_v21 = vsel %vm1332_vm15, %v1334_v19, %v1330_v57 }
 0xaa9   : > { %v1336_v23 = vmul.f32 %v1335_v21, %v1311_v20  ;;  %v1358_v24 = vmul.f32 %v1357_v59, %v1340_v2  ;;  %v1347_v38 = vmul.f32 %v1346_v28, %v1340_v2 }
 0xaab   : > { %v1559_v26 = vclamps-f32 %v1336_v23, 1.0  ;;  %v1359_v27 = vadd.f32 0.4994258, %v1358_v24  ;;  %v1348_v31 = vadd.f32 0.18741608, %v1347_v38 }
 0xaad   : > { %v1379_v34 = vadd.f32 1.0, %v1559_v26  ;;  %v1360_v35 = vmul.f32 %v1359_v27, %v1340_v2  ;;  %v1349_v13 = vmul.f32 %v1348_v31, %v1340_v2 }
 0xaaf   : > { %v1381_v36 = vmul.f32 %v1379_v34, %v1288_v29  ;;  %v1361_v37 = vadd.f32 1.0, %v1360_v35  ;;  %v1350_v43 = vadd.f32 1.1283791, %v1349_v13 }
 0xab1   : > { %1694 = vrcp.f32 %v1361_v37  ;;  %1565 = vmatmul.msk.f32.vlgmr.msra.gmra.mxu1 %vm298_vm8, %v1381_v36  ;;  %v1373_v42 = vand.u32 2147483648, %v1361_v37  ;;  %v1371_v44 = vand.u32 2147483647, %v1361_v37  ;;  %vm1367_vm2 = vweird.f32 %v1361_v37 }
 0xab2   : > { %v1351_v58 = vmul.f32 %v1350_v43, %v1298_v61 }
 0xab3   : > { %v1374_v30 = vor.u32 1.1754944e-38, %v1373_v42  ;;  %vm1372_vm4 = vcmp.eq.f32.partialorder %v1371_v44, 8.507059e+37 }
 0xab7   : > { %v1695_v39 = vpop.eup %1694 }
 0xab8   : > { %v1363_v50 = vmul.f32 %v1695_v39, %v1361_v37  ;;  %vm1368_vm1 = vweird.f32 %v1695_v39 }
 0xab9   : > { %vm1369_vm3 = vmor %vm1367_vm2, %vm1368_vm1 }
 0xaba   : > { %v1364_v41 = vsub.f32 1.0, %v1363_v50 }
 0xabc   : > { %v1365_v14 = vmul.f32 %v1695_v39, %v1364_v41 }
 0xabe   : > { %v1366_v49 = vadd.f32 %v1695_v39, %v1365_v14 }
 0xac0   : > { %v1370_v45 = vsel %vm1369_vm3, %v1695_v39, %v1366_v49 }
 0xac1   : > { %v1375_v46 = vsel %vm1372_vm4, %v1374_v30, %v1370_v45 }
 0xac2   : > { %v1376_v47 = vmul.f32 %v1375_v46, %v1351_v58 }
 0xac4   : > { %v1560_v48 = vclamps-f32 %v1376_v47, 1.0 }
 0xac6   : > { %v1380_v52 = vadd.f32 1.0, %v1560_v48 }
 0xac8   : > { %v1382_v53 = vmul.f32 %v1380_v52, %v1289_v51 }
 0xaca   : > { %1566 = vmatmul.msk.f32.gmra.mxu1 %vm298_vm8, %v1382_v53 }
 0xb2e   : > { %v1412_v60 = vpop.f32.mrf.mxu1 }
 0xb2f   : > { %v1413_v63 = vadd.f32 %v1412_v60, %v1388_v56 }
 0xb31   : > { %v1418_v1 = vadd.f32 %v1413_v63, %v2092_v32 }
 0xb33   : > { %1420 = vst.msk [vmem:[#allocation5] sm:$0xff] %vm298_vm8, %v1418_v1 }
 0xb47   : > { %v1415_v61 = vpop.f32.mrf.mxu1 }
 0xb48   : > { %v1416_v55 = vadd.f32 %v1415_v61, %v1388_v56 }
 0xb4a   : > { %v1419_v2 = vadd.f32 %v1416_v55, %v2098_v40 }
 0xb4c   : > { %1421 = vst.msk [vmem:[#allocation5 + $0x8] sm:$0xff] %vm298_vm8, %v1419_v2 }
 0xb4d   : > { %1582 = dma.vmem_to_hbm [thread:$0]  (%p1590_p7), %s1428_s26, 256, %s1430_s30, [#allocation4], %s1803_s28, %s1803_s28, %s1804_s5  }
 0xb4e   : > { %1775 = dma.done.wait (%p1590_p7), [#allocation4], 256  }
 0xb4f   : > { %1777 = vsyncadd (%p1590_p7), [#allocation4], 4294967040 }
 0xb50 PF: > { %p15_p9 = scmp.ge.s32.totalorder %s1852_s20, 4   ;;  %s2165_s15 = smov %s1784_s16 }
 0xb51   : > { %s2166_s16 = smov %s1788_s17  ;;  %s2167_s17 = smov %s1862_s23 }
 0xb52   : > { %s2168_s18 = smov %s1852_s20  ;;  %17 = sbr.rel (!%p15_p9) target bundleno = 4 (0x4), region = 85 }
 0xb57   :  { %1446 = vsyncpa [#allocation3], 1 }
 0xb58   :  { %1448 = vsyncpa [#allocation3 + $0x1], 1 }
 0xb59   :  { %1449 = vsyncpa [#allocation4], 1 }
 0xb5a   :  { %1451 = vsyncpa [#allocation4 + $0x1], 1 }

</bundles_post_ra>
